<compile_context>
chip_gen: v5e
topology: v5e:2x2
jax: 0.10.0
libtpu: 0.0.40
codegen_flags: <defaults>
</compile_context>

<pallas_src>
import functools

import jax
import jax.numpy as jnp
from jax.experimental import pallas as pl
from jax.experimental.pallas import tpu as pltpu


GATE_PAD = 128   # each LSTM gate padded to a full 128-lane block
KV_PAD = 128     # K and V each padded to a 128-lane block in the fused KV matmul
OUT_PAD = 128    # logits padded to 128 lanes for an unmasked store


# ----------------------------------------------------------------------------
# Pallas kernel: whole forward pass fused, single invocation, everything VMEM.
# ----------------------------------------------------------------------------
def _lotto_kernel(
    x_ref,                    # (T*2B, 2D+2) bf16  fwd/bwd sublane-stacked input (+bias one-hots)
    wih_ref,                  # (2D+2, 4*GP) bf16  [wih_f ; wih_b ; b_f ; b_b], gate-padded
    whh_ref,                  # (2H, 4*GP)   bf16  rows 0:H = whh_f, rows H:2H = whh_b
    wq_ref, bq_ref,           # (2H, 2H) bf16, (1, 2H) f32
    wkv_ref, bkv_ref,         # (2H, 2*KV_PAD) bf16, (1, 2*KV_PAD) f32 (K half zero)
    w1_ref, b1_ref,           # (2H, 96) bf16, (1, 96) f32
    w2_ref, b2_ref,           # (96, OUT_PAD) bf16, (1, OUT_PAD) f32
    out_ref,                  # (B, OUT_PAD) f32
    gi_ref,                   # scratch VMEM (T*2B, 4*GP) f32 : hoisted input gates
    lstm_ref,                 # scratch VMEM (T*B, 2H)    f32 : time-major [fwd|bwd] LSTM output
    *, T, B, H,
):
    f32 = jnp.float32
    bf16 = jnp.bfloat16
    GP = GATE_PAD
    H2 = 2 * H
    B2 = 2 * B

    # ---- hoisted input projection, both directions + biases, one MXU call ---
    # Row layout per step s: rows 0:B = fwd gates of x[s], rows B:2B = bwd
    # gates of x[T-1-s].  Written to VMEM scratch -> no vreg residency across
    # the unrolled recurrence.
    gi_ref[...] = jnp.dot(x_ref[...], wih_ref[...], preferred_element_type=f32)

    whh = whh_ref[...]                                             # (2H, 4*GP) bf16

    # constant block mask: rows 0:B own lanes 0:H (fwd), rows B:2B own lanes
    # H:2H (bwd) -> builds the zero-block LHS for the recurrent matmul.
    mrow = jax.lax.broadcasted_iota(jnp.int32, (B2, H2), 0)
    mcol = jax.lax.broadcasted_iota(jnp.int32, (B2, H2), 1)
    kmask = ((mrow < B) == (mcol < H)).astype(f32)

    def cell(g, c):
        # gate blocks start at lane-aligned offsets 0/128/256/384
        i = jax.nn.sigmoid(g[:, 0 * GP:0 * GP + H])
        f = jax.nn.sigmoid(g[:, 1 * GP:1 * GP + H])
        gg = jnp.tanh(g[:, 2 * GP:2 * GP + H])
        o = jax.nn.sigmoid(g[:, 3 * GP:3 * GP + H])
        c_new = f * c + i * gg
        return o * jnp.tanh(c_new), c_new

    # ---- merged fwd/bwd recurrence, fully unrolled (T small & static) -------
    # NOTE: on v5e one could hold whh in MXU weight staging across the 8 steps
    # (pltpu.matmul_push_rhs / matmul_acc_lhs); skipped here, jnp.dot keeps the
    # kernel portable across v5e/v6e/v7x.
    h_stack = jnp.zeros((B2, H2), f32)   # rows 0:B = [h_f, 0], rows B:2B = [0, h_b]
    c = jnp.zeros((B2, H), f32)
    for s in range(T):
        g = (gi_ref[s * B2:(s + 1) * B2, :]
             + jnp.dot(h_stack.astype(bf16), whh, preferred_element_type=f32))
        h_new, c = cell(g, c)            # (2B, H): rows 0:B = fwd(t=s), rows B:2B = bwd(t=T-1-s)
        # write straight into the time-major [fwd | bwd] LSTM-output slab
        lstm_ref[s * B:(s + 1) * B, 0:H] = h_new[0:B, :]
        lstm_ref[(T - 1 - s) * B:(T - s) * B, H:H2] = h_new[B:B2, :]
        # widen to the zero-block layout that feeds the next recurrent matmul
        h_stack = kmask * jnp.concatenate([h_new, h_new], axis=1)

    lstm_flat = lstm_ref[...]                                      # (T*B, 2H)
    h_last = lstm_ref[(T - 1) * B:T * B, :]                        # (B, 2H)

    # ---- attention: only the last query row is live (context[:, -1, :]) -----
    q = (jnp.dot(h_last.astype(bf16), wq_ref[...], preferred_element_type=f32)
         + bq_ref[...])                                            # (B, 2H)
    kv = (jnp.dot(lstm_flat.astype(bf16), wkv_ref[...], preferred_element_type=f32)
          + bkv_ref[...])                                          # (T*B, 2*KV_PAD)
    k = kv[:, 0:H2]
    v = kv[:, KV_PAD:KV_PAD + H2]

    scale = 1.0 / jnp.sqrt(jnp.float32(H2))
    scores = jax.lax.dot_general(q, k, (((1,), (1,)), ((), ())),
                                 preferred_element_type=f32) * scale   # (B, T*B)
    # column j of `scores` belongs to batch (j % B); mask the rest so one
    # batched softmax replaces a per-batch loop.
    scol = jax.lax.broadcasted_iota(jnp.int32, (B, T * B), 1)
    srow = jax.lax.broadcasted_iota(jnp.int32, (B, T * B), 0)
    scores = jnp.where(scol % B == srow, scores, jnp.float32(-1e30))
    m = jnp.max(scores, axis=-1, keepdims=True)
    e = jnp.exp(scores - m)
    attn = e * pl.reciprocal(jnp.sum(e, axis=-1, keepdims=True), approx=True)
    ctx = jnp.dot(attn, v, preferred_element_type=f32)             # (B, 2H)

    # ---- heads (dropout = identity at inference) -----------------------------
    h1 = jnp.maximum(
        jnp.dot(ctx.astype(bf16), w1_ref[...], preferred_element_type=f32)
        + b1_ref[...], 0.0)
    out_ref[...] = (jnp.dot(h1.astype(bf16), w2_ref[...], preferred_element_type=f32)
                    + b2_ref[...]).astype(out_ref.dtype)


# ----------------------------------------------------------------------------
# One-time weight packing (lane-padded gates, no block-diag zeros, bf16 MXU
# operands, fused K|V with the K bias dropped, padded fc2).
# ----------------------------------------------------------------------------
def pack_params(p):
    H = p["whh_f"].shape[0]
    GP = GATE_PAD
    bf16 = jnp.bfloat16

    def pad_gates(w):                       # (in, 4H) -> (in, 4*GP)
        return jnp.concatenate(
            [jnp.pad(w[:, g * H:(g + 1) * H], ((0, 0), (0, GP - H)))
             for g in range(4)], axis=1)

    def pad_cols(w, to):
        return jnp.pad(w, ((0, 0), (0, to - w.shape[1])))

    # input projection: K-rows = [wih_f ; wih_b ; bias_f ; bias_b]  (2D+2, 4*GP)
    wih = jnp.concatenate([pad_gates(p["wih_f"]), pad_gates(p["wih_b"]),
                           pad_gates(p["bf"]), pad_gates(p["bb"])], axis=0)

    # recurrent weights: fwd in K-rows 0:H, bwd in K-rows H:2H, same gate cols
    whh = jnp.concatenate([pad_gates(p["whh_f"]), pad_gates(p["whh_b"])], axis=0)

    # fused K|V projection; K bias dropped (softmax shift invariance)
    wkv = jnp.concatenate([pad_cols(p["wk"], KV_PAD), pad_cols(p["wv"], KV_PAD)], axis=1)
    bkv = jnp.concatenate([jnp.zeros((1, KV_PAD), jnp.float32),
                           pad_cols(p["bv"], KV_PAD)], axis=1)

    return {
        "wih": wih.astype(bf16), "whh": whh.astype(bf16),
        "wq": p["wq"].astype(bf16), "bq": p["bq"],
        "wkv": wkv.astype(bf16), "bkv": bkv,
        "w1": p["w1"].astype(bf16), "b1": p["b1"],
        "w2": pad_cols(p["w2"], OUT_PAD).astype(bf16), "b2": pad_cols(p["b2"], OUT_PAD),
    }


# ----------------------------------------------------------------------------
# Wrapper: layout plumbing + single-invocation pallas_call, one jit dispatch.
# ----------------------------------------------------------------------------
@jax.jit
def lotto_forward(x_btd, packed):
    """x_btd: (B, T, 30) float32 -> logits (B, 45)."""
    B, T, D = x_btd.shape
    H = packed["wq"].shape[0] // 2

    # Sublane-stacked, time-major input with bias one-hot columns:
    # per step s: rows 0:B = [x[s], 0, 1, 0], rows B:2B = [0, x[T-1-s], 0, 1].
    x_tbd = jnp.transpose(x_btd, (1, 0, 2)).astype(jnp.float32)          # (T, B, D)
    zeros = jnp.zeros((T, B, D), jnp.float32)
    ones = jnp.ones((T, B, 1), jnp.float32)
    zcol = jnp.zeros((T, B, 1), jnp.float32)
    fwd_rows = jnp.concatenate([x_tbd, zeros, ones, zcol], axis=-1)
    bwd_rows = jnp.concatenate([zeros, x_tbd[::-1], zcol, ones], axis=-1)
    x_packed = jnp.concatenate([fwd_rows, bwd_rows], axis=1)             # (T, 2B, 2D+2)
    x_packed = x_packed.reshape(T * 2 * B, 2 * D + 2).astype(jnp.bfloat16)

    inputs = [
        x_packed,
        packed["wih"], packed["whh"],
        packed["wq"], packed["bq"],
        packed["wkv"], packed["bkv"],
        packed["w1"], packed["b1"],
        packed["w2"], packed["b2"],
    ]

    kernel = functools.partial(_lotto_kernel, T=T, B=B, H=H)
    out = pl.pallas_call(
        kernel,
        out_shape=jax.ShapeDtypeStruct((B, OUT_PAD), jnp.float32),
        in_specs=[pl.BlockSpec(memory_space=pltpu.MemorySpace.VMEM)] * len(inputs),
        out_specs=pl.BlockSpec(memory_space=pltpu.MemorySpace.VMEM),
        scratch_shapes=[
            pltpu.VMEM((T * 2 * B, 4 * GATE_PAD), jnp.float32),   # hoisted input gates
            pltpu.VMEM((T * B, 2 * H), jnp.float32),              # LSTM output slab
        ],
    )(*inputs)
    return out[:, :45]


# ----------------------------------------------------------------------------
# Deterministic synthetic parameters (shapes from CombinationLottoModel.__init__)
# ----------------------------------------------------------------------------
def init_params(key, input_dim=30, hidden=48):
    H, H2 = hidden, 2 * hidden
    ks = jax.random.split(key, 16)

    def w(k, shape, scale=0.1):
        return scale * jax.random.normal(k, shape, dtype=jnp.float32)

    return {
        # LSTM weights pre-transposed to (in, out); bias = b_ih + b_hh combined.
        "wih_f": w(ks[0], (input_dim, 4 * H)),
        "whh_f": w(ks[1], (H, 4 * H)),
        "bf": w(ks[2], (1, 4 * H)),
        "wih_b": w(ks[3], (input_dim, 4 * H)),
        "whh_b": w(ks[4], (H, 4 * H)),
        "bb": w(ks[5], (1, 4 * H)),
        "wq": w(ks[6], (H2, H2)), "bq": w(ks[7], (1, H2)),
        "wk": w(ks[8], (H2, H2)), "bk": w(ks[9], (1, H2)),
        "wv": w(ks[10], (H2, H2)), "bv": w(ks[11], (1, H2)),
        "w1": w(ks[12], (H2, 96)), "b1": w(ks[13], (1, 96)),
        "w2": w(ks[14], (96, 45)), "b2": w(ks[15], (1, 45)),
    }


# ----------------------------------------------------------------------------
# Pure-JAX reference (same math, unpadded f32 weights) for the correctness check.
# ----------------------------------------------------------------------------
def reference_forward(x, p):
    B, T, D = x.shape
    H = p["whh_f"].shape[0]

    def lstm_dir(x_tbd, wih, whh, b):
        def step(carry, x_t):
            h, c = carry
            g = x_t @ wih + h @ whh + b
            i = jax.nn.sigmoid(g[:, 0:H])
            f = jax.nn.sigmoid(g[:, H:2 * H])
            gg = jnp.tanh(g[:, 2 * H:3 * H])
            o = jax.nn.sigmoid(g[:, 3 * H:4 * H])
            c = f * c + i * gg
            h = o * jnp.tanh(c)
            return (h, c), h

        h0 = jnp.zeros((B, H), jnp.float32)
        c0 = jnp.zeros((B, H), jnp.float32)
        _, hs = jax.lax.scan(step, (h0, c0), x_tbd)
        return hs  # (T, B, H)

    x_tbd = jnp.transpose(x, (1, 0, 2))
    hf = lstm_dir(x_tbd, p["wih_f"], p["whh_f"], p["bf"])
    hb = lstm_dir(x_tbd[::-1], p["wih_b"], p["whh_b"], p["bb"])[::-1]
    lo = jnp.transpose(jnp.concatenate([hf, hb], -1), (1, 0, 2))  # (B, T, 2H)

    q = lo @ p["wq"] + p["bq"]
    k = lo @ p["wk"] + p["bk"]
    v = lo @ p["wv"] + p["bv"]
    scores = jnp.einsum("btd,bsd->bts", q, k) / jnp.sqrt(jnp.float32(2 * H))
    attn = jax.nn.softmax(scores, axis=-1)
    ctx = jnp.einsum("bts,bsd->btd", attn, v)
    last = ctx[:, -1, :]
    h1 = jax.nn.relu(last @ p["w1"] + p["b1"])
    return h1 @ p["w2"] + p["b2"]


if __name__ == "__main__":
    key = jax.random.PRNGKey(0)
    k_x, k_p = jax.random.split(key)

    B, T, D = 2, 8, 30  # batch=2, seq=8, input_dim=30 (per the module)
    x = jax.random.normal(k_x, (B, T, D), dtype=jnp.float32)
    params = init_params(k_p, input_dim=D, hidden=48)
    packed = pack_params(params)

    logits = lotto_forward(x, packed)
    logits = jax.block_until_ready(logits)

    ref = jax.block_until_ready(reference_forward(x, params))
    max_diff = float(jnp.max(jnp.abs(logits - ref)))
    assert logits.shape == (B, 45), logits.shape
    # MXU operands are bf16 (f32 accumulation) and the softmax reciprocal is
    # the approximate EUP one, so the expected max error is ~1e-2; 5e-2 gives
    # comfortable headroom while still catching real layout/packing bugs.
    assert max_diff < 5e-2, f"mismatch vs reference: max |diff| = {max_diff}"

    print("KERNEL_OK")
</pallas_src>

<mosaic_0001>
module attributes {stable_mosaic.version = 11 : i64} {
  func.func @_lotto_kernel(%arg0: memref<32x62xbf16, #tpu.memory_space<vmem>>, %arg1: memref<62x512xbf16, #tpu.memory_space<vmem>>, %arg2: memref<96x512xbf16, #tpu.memory_space<vmem>>, %arg3: memref<96x96xbf16, #tpu.memory_space<vmem>>, %arg4: memref<1x96xf32, #tpu.memory_space<vmem>>, %arg5: memref<96x256xbf16, #tpu.memory_space<vmem>>, %arg6: memref<1x256xf32, #tpu.memory_space<vmem>>, %arg7: memref<96x96xbf16, #tpu.memory_space<vmem>>, %arg8: memref<1x96xf32, #tpu.memory_space<vmem>>, %arg9: memref<96x128xbf16, #tpu.memory_space<vmem>>, %arg10: memref<1x128xf32, #tpu.memory_space<vmem>>, %arg11: memref<2x128xf32, #tpu.memory_space<vmem>>, %arg12: memref<32x512xf32, #tpu.memory_space<vmem>>, %arg13: memref<16x96xf32, #tpu.memory_space<vmem>>) attributes {dimension_semantics = [], scalar_prefetch = 0 : i64, scratch_operands = 2 : i64, tpu.core_type = #tpu.core_type<tc>} {
    %c0 = arith.constant 0 : index
    %c0_0 = arith.constant 0 : index
    %0 = vector.load %arg0[%c0, %c0_0] : memref<32x62xbf16, #tpu.memory_space<vmem>>, vector<32x62xbf16>
    %c0_1 = arith.constant 0 : index
    %c0_2 = arith.constant 0 : index
    %1 = vector.load %arg1[%c0_1, %c0_2] : memref<62x512xbf16, #tpu.memory_space<vmem>>, vector<62x512xbf16>
    %cst = arith.constant dense<0.000000e+00> : vector<32x512xf32>
    %2 = tpu.matmul %0, %1, %cst {dimension_numbers = #tpu.dot_dimension_numbers<[1], [0], [0], [1], [0, 0, 1, 1], [], []>} : vector<32x62xbf16>, vector<62x512xbf16>, vector<32x512xf32> -> vector<32x512xf32>
    %c0_3 = arith.constant 0 : index
    %c0_4 = arith.constant 0 : index
    %3 = vector.load %arg12[%c0_3, %c0_4] : memref<32x512xf32, #tpu.memory_space<vmem>>, vector<32x512xf32>
    tpu.vector_store %arg12[%c0_3, %c0_4], %2 {strides = array<i32>} : memref<32x512xf32, #tpu.memory_space<vmem>>, vector<32x512xf32>,
    %c0_5 = arith.constant 0 : index
    %c0_6 = arith.constant 0 : index
    %4 = vector.load %arg2[%c0_5, %c0_6] : memref<96x512xbf16, #tpu.memory_space<vmem>>, vector<96x512xbf16>
    %5 = tpu.iota {dimensions = array<i32: 0>} : vector<4x96xi32>
    %6 = tpu.iota {dimensions = array<i32: 1>} : vector<4x96xi32>
    %c2_i32 = arith.constant 2 : i32
    %7 = vector.broadcast %c2_i32 : i32 to vector<4x96xi32>
    %8 = arith.cmpi slt, %5, %7 : vector<4x96xi32>
    %c48_i32 = arith.constant 48 : i32
    %9 = vector.broadcast %c48_i32 : i32 to vector<4x96xi32>
    %10 = arith.cmpi slt, %6, %9 : vector<4x96xi32>
    %11 = arith.xori %8, %10 : vector<4x96xi1>
    %cst_7 = arith.constant dense<true> : vector<4x96xi1>
    %12 = arith.xori %11, %cst_7 : vector<4x96xi1>
    %13 = arith.extui %12 : vector<4x96xi1> to vector<4x96xi32>
    %14 = arith.sitofp %13 : vector<4x96xi32> to vector<4x96xf32>
    %cst_8 = arith.constant 0.000000e+00 : f32
    %15 = vector.broadcast %cst_8 : f32 to vector<4x96xf32>
    %cst_9 = arith.constant 0.000000e+00 : f32
    %16 = vector.broadcast %cst_9 : f32 to vector<4x48xf32>
    %c0_10 = arith.constant 0 : index
    %c0_11 = arith.constant 0 : index
    %17 = vector.load %arg12[%c0_10, %c0_11] : memref<32x512xf32, #tpu.memory_space<vmem>>, vector<4x512xf32>
    %18 = arith.truncf %15 : vector<4x96xf32> to vector<4x96xbf16>
    %cst_12 = arith.constant dense<0.000000e+00> : vector<4x512xf32>
    %19 = tpu.matmul %18, %4, %cst_12 {dimension_numbers = #tpu.dot_dimension_numbers<[1], [0], [0], [1], [0, 0, 1, 1], [], []>} : vector<4x96xbf16>, vector<96x512xbf16>, vector<4x512xf32> -> vector<4x512xf32>
    %20 = arith.addf %17, %19 : vector<4x512xf32>
    %21 = vector.extract_strided_slice %20 {offsets = [0, 0], sizes = [4, 48], strides = [1, 1]} : vector<4x512xf32> to vector<4x48xf32>
    %22 = arith.negf %21 : vector<4x48xf32>
    %23 = math.exp %22 : vector<4x48xf32>
    %cst_13 = arith.constant 1.000000e+00 : f32
    %24 = vector.broadcast %cst_13 : f32 to vector<4x48xf32>
    %25 = arith.addf %24, %23 : vector<4x48xf32>
    %26 = arith.divf %24, %25 : vector<4x48xf32>
    %27 = vector.extract_strided_slice %20 {offsets = [0, 128], sizes = [4, 48], strides = [1, 1]} : vector<4x512xf32> to vector<4x48xf32>
    %28 = arith.negf %27 : vector<4x48xf32>
    %29 = math.exp %28 : vector<4x48xf32>
    %cst_14 = arith.constant 1.000000e+00 : f32
    %30 = vector.broadcast %cst_14 : f32 to vector<4x48xf32>
    %31 = arith.addf %30, %29 : vector<4x48xf32>
    %32 = arith.divf %30, %31 : vector<4x48xf32>
    %33 = vector.extract_strided_slice %20 {offsets = [0, 256], sizes = [4, 48], strides = [1, 1]} : vector<4x512xf32> to vector<4x48xf32>
    %34 = math.tanh %33 : vector<4x48xf32>
    %35 = vector.extract_strided_slice %20 {offsets = [0, 384], sizes = [4, 48], strides = [1, 1]} : vector<4x512xf32> to vector<4x48xf32>
    %36 = arith.negf %35 : vector<4x48xf32>
    %37 = math.exp %36 : vector<4x48xf32>
    %cst_15 = arith.constant 1.000000e+00 : f32
    %38 = vector.broadcast %cst_15 : f32 to vector<4x48xf32>
    %39 = arith.addf %38, %37 : vector<4x48xf32>
    %40 = arith.divf %38, %39 : vector<4x48xf32>
    %41 = arith.mulf %32, %16 : vector<4x48xf32>
    %42 = arith.mulf %26, %34 : vector<4x48xf32>
    %43 = arith.addf %41, %42 : vector<4x48xf32>
    %44 = math.tanh %43 : vector<4x48xf32>
    %45 = arith.mulf %40, %44 : vector<4x48xf32>
    %46 = vector.extract_strided_slice %45 {offsets = [0, 0], sizes = [2, 48], strides = [1, 1]} : vector<4x48xf32> to vector<2x48xf32>
    %c0_16 = arith.constant 0 : index
    %c0_17 = arith.constant 0 : index
    %47 = vector.load %arg13[%c0_16, %c0_17] : memref<16x96xf32, #tpu.memory_space<vmem>>, vector<2x48xf32>
    tpu.vector_store %arg13[%c0_16, %c0_17], %46 {strides = array<i32>} : memref<16x96xf32, #tpu.memory_space<vmem>>, vector<2x48xf32>,
    %48 = vector.extract_strided_slice %45 {offsets = [2, 0], sizes = [2, 48], strides = [1, 1]} : vector<4x48xf32> to vector<2x48xf32>
    %c14 = arith.constant 14 : index
    %c48 = arith.constant 48 : index
    %49 = vector.load %arg13[%c14, %c48] : memref<16x96xf32, #tpu.memory_space<vmem>>, vector<2x48xf32>
    tpu.vector_store %arg13[%c14, %c48], %48 {strides = array<i32>} : memref<16x96xf32, #tpu.memory_space<vmem>>, vector<2x48xf32>,
    %50 = tpu.concatenate %45, %45 in 1 : vector<4x48xf32>, vector<4x48xf32> -> vector<4x96xf32>
    %51 = arith.mulf %14, %50 : vector<4x96xf32>
    %c4 = arith.constant 4 : index
    %c0_18 = arith.constant 0 : index
    %52 = vector.load %arg12[%c4, %c0_18] : memref<32x512xf32, #tpu.memory_space<vmem>>, vector<4x512xf32>
    %53 = arith.truncf %51 : vector<4x96xf32> to vector<4x96xbf16>
    %cst_19 = arith.constant dense<0.000000e+00> : vector<4x512xf32>
    %54 = tpu.matmul %53, %4, %cst_19 {dimension_numbers = #tpu.dot_dimension_numbers<[1], [0], [0], [1], [0, 0, 1, 1], [], []>} : vector<4x96xbf16>, vector<96x512xbf16>, vector<4x512xf32> -> vector<4x512xf32>
    %55 = arith.addf %52, %54 : vector<4x512xf32>
    %56 = vector.extract_strided_slice %55 {offsets = [0, 0], sizes = [4, 48], strides = [1, 1]} : vector<4x512xf32> to vector<4x48xf32>
    %57 = arith.negf %56 : vector<4x48xf32>
    %58 = math.exp %57 : vector<4x48xf32>
    %cst_20 = arith.constant 1.000000e+00 : f32
    %59 = vector.broadcast %cst_20 : f32 to vector<4x48xf32>
    %60 = arith.addf %59, %58 : vector<4x48xf32>
    %61 = arith.divf %59, %60 : vector<4x48xf32>
    %62 = vector.extract_strided_slice %55 {offsets = [0, 128], sizes = [4, 48], strides = [1, 1]} : vector<4x512xf32> to vector<4x48xf32>
    %63 = arith.negf %62 : vector<4x48xf32>
    %64 = math.exp %63 : vector<4x48xf32>
    %cst_21 = arith.constant 1.000000e+00 : f32
    %65 = vector.broadcast %cst_21 : f32 to vector<4x48xf32>
    %66 = arith.addf %65, %64 : vector<4x48xf32>
    %67 = arith.divf %65, %66 : vector<4x48xf32>
    %68 = vector.extract_strided_slice %55 {offsets = [0, 256], sizes = [4, 48], strides = [1, 1]} : vector<4x512xf32> to vector<4x48xf32>
    %69 = math.tanh %68 : vector<4x48xf32>
    %70 = vector.extract_strided_slice %55 {offsets = [0, 384], sizes = [4, 48], strides = [1, 1]} : vector<4x512xf32> to vector<4x48xf32>
    %71 = arith.negf %70 : vector<4x48xf32>
    %72 = math.exp %71 : vector<4x48xf32>
    %cst_22 = arith.constant 1.000000e+00 : f32
    %73 = vector.broadcast %cst_22 : f32 to vector<4x48xf32>
    %74 = arith.addf %73, %72 : vector<4x48xf32>
    %75 = arith.divf %73, %74 : vector<4x48xf32>
    %76 = arith.mulf %67, %43 : vector<4x48xf32>
    %77 = arith.mulf %61, %69 : vector<4x48xf32>
    %78 = arith.addf %76, %77 : vector<4x48xf32>
    %79 = math.tanh %78 : vector<4x48xf32>
    %80 = arith.mulf %75, %79 : vector<4x48xf32>
    %81 = vector.extract_strided_slice %80 {offsets = [0, 0], sizes = [2, 48], strides = [1, 1]} : vector<4x48xf32> to vector<2x48xf32>
    %c2 = arith.constant 2 : index
    %c0_23 = arith.constant 0 : index
    %82 = vector.load %arg13[%c2, %c0_23] : memref<16x96xf32, #tpu.memory_space<vmem>>, vector<2x48xf32>
    tpu.vector_store %arg13[%c2, %c0_23], %81 {strides = array<i32>} : memref<16x96xf32, #tpu.memory_space<vmem>>, vector<2x48xf32>,
    %83 = vector.extract_strided_slice %80 {offsets = [2, 0], sizes = [2, 48], strides = [1, 1]} : vector<4x48xf32> to vector<2x48xf32>
    %c12 = arith.constant 12 : index
    %c48_24 = arith.constant 48 : index
    %84 = vector.load %arg13[%c12, %c48_24] : memref<16x96xf32, #tpu.memory_space<vmem>>, vector<2x48xf32>
    tpu.vector_store %arg13[%c12, %c48_24], %83 {strides = array<i32>} : memref<16x96xf32, #tpu.memory_space<vmem>>, vector<2x48xf32>,
    %85 = tpu.concatenate %80, %80 in 1 : vector<4x48xf32>, vector<4x48xf32> -> vector<4x96xf32>
    %86 = arith.mulf %14, %85 : vector<4x96xf32>
    %c8 = arith.constant 8 : index
    %c0_25 = arith.constant 0 : index
    %87 = vector.load %arg12[%c8, %c0_25] : memref<32x512xf32, #tpu.memory_space<vmem>>, vector<4x512xf32>
    %88 = arith.truncf %86 : vector<4x96xf32> to vector<4x96xbf16>
    %cst_26 = arith.constant dense<0.000000e+00> : vector<4x512xf32>
    %89 = tpu.matmul %88, %4, %cst_26 {dimension_numbers = #tpu.dot_dimension_numbers<[1], [0], [0], [1], [0, 0, 1, 1], [], []>} : vector<4x96xbf16>, vector<96x512xbf16>, vector<4x512xf32> -> vector<4x512xf32>
    %90 = arith.addf %87, %89 : vector<4x512xf32>
    %91 = vector.extract_strided_slice %90 {offsets = [0, 0], sizes = [4, 48], strides = [1, 1]} : vector<4x512xf32> to vector<4x48xf32>
    %92 = arith.negf %91 : vector<4x48xf32>
    %93 = math.exp %92 : vector<4x48xf32>
    %cst_27 = arith.constant 1.000000e+00 : f32
    %94 = vector.broadcast %cst_27 : f32 to vector<4x48xf32>
    %95 = arith.addf %94, %93 : vector<4x48xf32>
    %96 = arith.divf %94, %95 : vector<4x48xf32>
    %97 = vector.extract_strided_slice %90 {offsets = [0, 128], sizes = [4, 48], strides = [1, 1]} : vector<4x512xf32> to vector<4x48xf32>
    %98 = arith.negf %97 : vector<4x48xf32>
    %99 = math.exp %98 : vector<4x48xf32>
    %cst_28 = arith.constant 1.000000e+00 : f32
    %100 = vector.broadcast %cst_28 : f32 to vector<4x48xf32>
    %101 = arith.addf %100, %99 : vector<4x48xf32>
    %102 = arith.divf %100, %101 : vector<4x48xf32>
    %103 = vector.extract_strided_slice %90 {offsets = [0, 256], sizes = [4, 48], strides = [1, 1]} : vector<4x512xf32> to vector<4x48xf32>
    %104 = math.tanh %103 : vector<4x48xf32>
    %105 = vector.extract_strided_slice %90 {offsets = [0, 384], sizes = [4, 48], strides = [1, 1]} : vector<4x512xf32> to vector<4x48xf32>
    %106 = arith.negf %105 : vector<4x48xf32>
    %107 = math.exp %106 : vector<4x48xf32>
    %cst_29 = arith.constant 1.000000e+00 : f32
    %108 = vector.broadcast %cst_29 : f32 to vector<4x48xf32>
    %109 = arith.addf %108, %107 : vector<4x48xf32>
    %110 = arith.divf %108, %109 : vector<4x48xf32>
    %111 = arith.mulf %102, %78 : vector<4x48xf32>
    %112 = arith.mulf %96, %104 : vector<4x48xf32>
    %113 = arith.addf %111, %112 : vector<4x48xf32>
    %114 = math.tanh %113 : vector<4x48xf32>
    %115 = arith.mulf %110, %114 : vector<4x48xf32>
    %116 = vector.extract_strided_slice %115 {offsets = [0, 0], sizes = [2, 48], strides = [1, 1]} : vector<4x48xf32> to vector<2x48xf32>
    %c4_30 = arith.constant 4 : index
    %c0_31 = arith.constant 0 : index
    %117 = vector.load %arg13[%c4_30, %c0_31] : memref<16x96xf32, #tpu.memory_space<vmem>>, vector<2x48xf32>
    tpu.vector_store %arg13[%c4_30, %c0_31], %116 {strides = array<i32>} : memref<16x96xf32, #tpu.memory_space<vmem>>, vector<2x48xf32>,
    %118 = vector.extract_strided_slice %115 {offsets = [2, 0], sizes = [2, 48], strides = [1, 1]} : vector<4x48xf32> to vector<2x48xf32>
    %c10 = arith.constant 10 : index
    %c48_32 = arith.constant 48 : index
    %119 = vector.load %arg13[%c10, %c48_32] : memref<16x96xf32, #tpu.memory_space<vmem>>, vector<2x48xf32>
    tpu.vector_store %arg13[%c10, %c48_32], %118 {strides = array<i32>} : memref<16x96xf32, #tpu.memory_space<vmem>>, vector<2x48xf32>,
    %120 = tpu.concatenate %115, %115 in 1 : vector<4x48xf32>, vector<4x48xf32> -> vector<4x96xf32>
    %121 = arith.mulf %14, %120 : vector<4x96xf32>
    %c12_33 = arith.constant 12 : index
    %c0_34 = arith.constant 0 : index
    %122 = vector.load %arg12[%c12_33, %c0_34] : memref<32x512xf32, #tpu.memory_space<vmem>>, vector<4x512xf32>
    %123 = arith.truncf %121 : vector<4x96xf32> to vector<4x96xbf16>
    %cst_35 = arith.constant dense<0.000000e+00> : vector<4x512xf32>
    %124 = tpu.matmul %123, %4, %cst_35 {dimension_numbers = #tpu.dot_dimension_numbers<[1], [0], [0], [1], [0, 0, 1, 1], [], []>} : vector<4x96xbf16>, vector<96x512xbf16>, vector<4x512xf32> -> vector<4x512xf32>
    %125 = arith.addf %122, %124 : vector<4x512xf32>
    %126 = vector.extract_strided_slice %125 {offsets = [0, 0], sizes = [4, 48], strides = [1, 1]} : vector<4x512xf32> to vector<4x48xf32>
    %127 = arith.negf %126 : vector<4x48xf32>
    %128 = math.exp %127 : vector<4x48xf32>
    %cst_36 = arith.constant 1.000000e+00 : f32
    %129 = vector.broadcast %cst_36 : f32 to vector<4x48xf32>
    %130 = arith.addf %129, %128 : vector<4x48xf32>
    %131 = arith.divf %129, %130 : vector<4x48xf32>
    %132 = vector.extract_strided_slice %125 {offsets = [0, 128], sizes = [4, 48], strides = [1, 1]} : vector<4x512xf32> to vector<4x48xf32>
    %133 = arith.negf %132 : vector<4x48xf32>
    %134 = math.exp %133 : vector<4x48xf32>
    %cst_37 = arith.constant 1.000000e+00 : f32
    %135 = vector.broadcast %cst_37 : f32 to vector<4x48xf32>
    %136 = arith.addf %135, %134 : vector<4x48xf32>
    %137 = arith.divf %135, %136 : vector<4x48xf32>
    %138 = vector.extract_strided_slice %125 {offsets = [0, 256], sizes = [4, 48], strides = [1, 1]} : vector<4x512xf32> to vector<4x48xf32>
    %139 = math.tanh %138 : vector<4x48xf32>
    %140 = vector.extract_strided_slice %125 {offsets = [0, 384], sizes = [4, 48], strides = [1, 1]} : vector<4x512xf32> to vector<4x48xf32>
    %141 = arith.negf %140 : vector<4x48xf32>
    %142 = math.exp %141 : vector<4x48xf32>
    %cst_38 = arith.constant 1.000000e+00 : f32
    %143 = vector.broadcast %cst_38 : f32 to vector<4x48xf32>
    %144 = arith.addf %143, %142 : vector<4x48xf32>
    %145 = arith.divf %143, %144 : vector<4x48xf32>
    %146 = arith.mulf %137, %113 : vector<4x48xf32>
    %147 = arith.mulf %131, %139 : vector<4x48xf32>
    %148 = arith.addf %146, %147 : vector<4x48xf32>
    %149 = math.tanh %148 : vector<4x48xf32>
    %150 = arith.mulf %145, %149 : vector<4x48xf32>
    %151 = vector.extract_strided_slice %150 {offsets = [0, 0], sizes = [2, 48], strides = [1, 1]} : vector<4x48xf32> to vector<2x48xf32>
    %c6 = arith.constant 6 : index
    %c0_39 = arith.constant 0 : index
    %152 = vector.load %arg13[%c6, %c0_39] : memref<16x96xf32, #tpu.memory_space<vmem>>, vector<2x48xf32>
    tpu.vector_store %arg13[%c6, %c0_39], %151 {strides = array<i32>} : memref<16x96xf32, #tpu.memory_space<vmem>>, vector<2x48xf32>,
    %153 = vector.extract_strided_slice %150 {offsets = [2, 0], sizes = [2, 48], strides = [1, 1]} : vector<4x48xf32> to vector<2x48xf32>
    %c8_40 = arith.constant 8 : index
    %c48_41 = arith.constant 48 : index
    %154 = vector.load %arg13[%c8_40, %c48_41] : memref<16x96xf32, #tpu.memory_space<vmem>>, vector<2x48xf32>
    tpu.vector_store %arg13[%c8_40, %c48_41], %153 {strides = array<i32>} : memref<16x96xf32, #tpu.memory_space<vmem>>, vector<2x48xf32>,
    %155 = tpu.concatenate %150, %150 in 1 : vector<4x48xf32>, vector<4x48xf32> -> vector<4x96xf32>
    %156 = arith.mulf %14, %155 : vector<4x96xf32>
    %c16 = arith.constant 16 : index
    %c0_42 = arith.constant 0 : index
    %157 = vector.load %arg12[%c16, %c0_42] : memref<32x512xf32, #tpu.memory_space<vmem>>, vector<4x512xf32>
    %158 = arith.truncf %156 : vector<4x96xf32> to vector<4x96xbf16>
    %cst_43 = arith.constant dense<0.000000e+00> : vector<4x512xf32>
    %159 = tpu.matmul %158, %4, %cst_43 {dimension_numbers = #tpu.dot_dimension_numbers<[1], [0], [0], [1], [0, 0, 1, 1], [], []>} : vector<4x96xbf16>, vector<96x512xbf16>, vector<4x512xf32> -> vector<4x512xf32>
    %160 = arith.addf %157, %159 : vector<4x512xf32>
    %161 = vector.extract_strided_slice %160 {offsets = [0, 0], sizes = [4, 48], strides = [1, 1]} : vector<4x512xf32> to vector<4x48xf32>
    %162 = arith.negf %161 : vector<4x48xf32>
    %163 = math.exp %162 : vector<4x48xf32>
    %cst_44 = arith.constant 1.000000e+00 : f32
    %164 = vector.broadcast %cst_44 : f32 to vector<4x48xf32>
    %165 = arith.addf %164, %163 : vector<4x48xf32>
    %166 = arith.divf %164, %165 : vector<4x48xf32>
    %167 = vector.extract_strided_slice %160 {offsets = [0, 128], sizes = [4, 48], strides = [1, 1]} : vector<4x512xf32> to vector<4x48xf32>
    %168 = arith.negf %167 : vector<4x48xf32>
    %169 = math.exp %168 : vector<4x48xf32>
    %cst_45 = arith.constant 1.000000e+00 : f32
    %170 = vector.broadcast %cst_45 : f32 to vector<4x48xf32>
    %171 = arith.addf %170, %169 : vector<4x48xf32>
    %172 = arith.divf %170, %171 : vector<4x48xf32>
    %173 = vector.extract_strided_slice %160 {offsets = [0, 256], sizes = [4, 48], strides = [1, 1]} : vector<4x512xf32> to vector<4x48xf32>
    %174 = math.tanh %173 : vector<4x48xf32>
    %175 = vector.extract_strided_slice %160 {offsets = [0, 384], sizes = [4, 48], strides = [1, 1]} : vector<4x512xf32> to vector<4x48xf32>
    %176 = arith.negf %175 : vector<4x48xf32>
    %177 = math.exp %176 : vector<4x48xf32>
    %cst_46 = arith.constant 1.000000e+00 : f32
    %178 = vector.broadcast %cst_46 : f32 to vector<4x48xf32>
    %179 = arith.addf %178, %177 : vector<4x48xf32>
    %180 = arith.divf %178, %179 : vector<4x48xf32>
    %181 = arith.mulf %172, %148 : vector<4x48xf32>
    %182 = arith.mulf %166, %174 : vector<4x48xf32>
    %183 = arith.addf %181, %182 : vector<4x48xf32>
    %184 = math.tanh %183 : vector<4x48xf32>
    %185 = arith.mulf %180, %184 : vector<4x48xf32>
    %186 = vector.extract_strided_slice %185 {offsets = [0, 0], sizes = [2, 48], strides = [1, 1]} : vector<4x48xf32> to vector<2x48xf32>
    %c8_47 = arith.constant 8 : index
    %c0_48 = arith.constant 0 : index
    %187 = vector.load %arg13[%c8_47, %c0_48] : memref<16x96xf32, #tpu.memory_space<vmem>>, vector<2x48xf32>
    tpu.vector_store %arg13[%c8_47, %c0_48], %186 {strides = array<i32>} : memref<16x96xf32, #tpu.memory_space<vmem>>, vector<2x48xf32>,
    %188 = vector.extract_strided_slice %185 {offsets = [2, 0], sizes = [2, 48], strides = [1, 1]} : vector<4x48xf32> to vector<2x48xf32>
    %c6_49 = arith.constant 6 : index
    %c48_50 = arith.constant 48 : index
    %189 = vector.load %arg13[%c6_49, %c48_50] : memref<16x96xf32, #tpu.memory_space<vmem>>, vector<2x48xf32>
    tpu.vector_store %arg13[%c6_49, %c48_50], %188 {strides = array<i32>} : memref<16x96xf32, #tpu.memory_space<vmem>>, vector<2x48xf32>,
    %190 = tpu.concatenate %185, %185 in 1 : vector<4x48xf32>, vector<4x48xf32> -> vector<4x96xf32>
    %191 = arith.mulf %14, %190 : vector<4x96xf32>
    %c20 = arith.constant 20 : index
    %c0_51 = arith.constant 0 : index
    %192 = vector.load %arg12[%c20, %c0_51] : memref<32x512xf32, #tpu.memory_space<vmem>>, vector<4x512xf32>
    %193 = arith.truncf %191 : vector<4x96xf32> to vector<4x96xbf16>
    %cst_52 = arith.constant dense<0.000000e+00> : vector<4x512xf32>
    %194 = tpu.matmul %193, %4, %cst_52 {dimension_numbers = #tpu.dot_dimension_numbers<[1], [0], [0], [1], [0, 0, 1, 1], [], []>} : vector<4x96xbf16>, vector<96x512xbf16>, vector<4x512xf32> -> vector<4x512xf32>
    %195 = arith.addf %192, %194 : vector<4x512xf32>
    %196 = vector.extract_strided_slice %195 {offsets = [0, 0], sizes = [4, 48], strides = [1, 1]} : vector<4x512xf32> to vector<4x48xf32>
    %197 = arith.negf %196 : vector<4x48xf32>
    %198 = math.exp %197 : vector<4x48xf32>
    %cst_53 = arith.constant 1.000000e+00 : f32
    %199 = vector.broadcast %cst_53 : f32 to vector<4x48xf32>
    %200 = arith.addf %199, %198 : vector<4x48xf32>
    %201 = arith.divf %199, %200 : vector<4x48xf32>
    %202 = vector.extract_strided_slice %195 {offsets = [0, 128], sizes = [4, 48], strides = [1, 1]} : vector<4x512xf32> to vector<4x48xf32>
    %203 = arith.negf %202 : vector<4x48xf32>
    %204 = math.exp %203 : vector<4x48xf32>
    %cst_54 = arith.constant 1.000000e+00 : f32
    %205 = vector.broadcast %cst_54 : f32 to vector<4x48xf32>
    %206 = arith.addf %205, %204 : vector<4x48xf32>
    %207 = arith.divf %205, %206 : vector<4x48xf32>
    %208 = vector.extract_strided_slice %195 {offsets = [0, 256], sizes = [4, 48], strides = [1, 1]} : vector<4x512xf32> to vector<4x48xf32>
    %209 = math.tanh %208 : vector<4x48xf32>
    %210 = vector.extract_strided_slice %195 {offsets = [0, 384], sizes = [4, 48], strides = [1, 1]} : vector<4x512xf32> to vector<4x48xf32>
    %211 = arith.negf %210 : vector<4x48xf32>
    %212 = math.exp %211 : vector<4x48xf32>
    %cst_55 = arith.constant 1.000000e+00 : f32
    %213 = vector.broadcast %cst_55 : f32 to vector<4x48xf32>
    %214 = arith.addf %213, %212 : vector<4x48xf32>
    %215 = arith.divf %213, %214 : vector<4x48xf32>
    %216 = arith.mulf %207, %183 : vector<4x48xf32>
    %217 = arith.mulf %201, %209 : vector<4x48xf32>
    %218 = arith.addf %216, %217 : vector<4x48xf32>
    %219 = math.tanh %218 : vector<4x48xf32>
    %220 = arith.mulf %215, %219 : vector<4x48xf32>
    %221 = vector.extract_strided_slice %220 {offsets = [0, 0], sizes = [2, 48], strides = [1, 1]} : vector<4x48xf32> to vector<2x48xf32>
    %c10_56 = arith.constant 10 : index
    %c0_57 = arith.constant 0 : index
    %222 = vector.load %arg13[%c10_56, %c0_57] : memref<16x96xf32, #tpu.memory_space<vmem>>, vector<2x48xf32>
    tpu.vector_store %arg13[%c10_56, %c0_57], %221 {strides = array<i32>} : memref<16x96xf32, #tpu.memory_space<vmem>>, vector<2x48xf32>,
    %223 = vector.extract_strided_slice %220 {offsets = [2, 0], sizes = [2, 48], strides = [1, 1]} : vector<4x48xf32> to vector<2x48xf32>
    %c4_58 = arith.constant 4 : index
    %c48_59 = arith.constant 48 : index
    %224 = vector.load %arg13[%c4_58, %c48_59] : memref<16x96xf32, #tpu.memory_space<vmem>>, vector<2x48xf32>
    tpu.vector_store %arg13[%c4_58, %c48_59], %223 {strides = array<i32>} : memref<16x96xf32, #tpu.memory_space<vmem>>, vector<2x48xf32>,
    %225 = tpu.concatenate %220, %220 in 1 : vector<4x48xf32>, vector<4x48xf32> -> vector<4x96xf32>
    %226 = arith.mulf %14, %225 : vector<4x96xf32>
    %c24 = arith.constant 24 : index
    %c0_60 = arith.constant 0 : index
    %227 = vector.load %arg12[%c24, %c0_60] : memref<32x512xf32, #tpu.memory_space<vmem>>, vector<4x512xf32>
    %228 = arith.truncf %226 : vector<4x96xf32> to vector<4x96xbf16>
    %cst_61 = arith.constant dense<0.000000e+00> : vector<4x512xf32>
    %229 = tpu.matmul %228, %4, %cst_61 {dimension_numbers = #tpu.dot_dimension_numbers<[1], [0], [0], [1], [0, 0, 1, 1], [], []>} : vector<4x96xbf16>, vector<96x512xbf16>, vector<4x512xf32> -> vector<4x512xf32>
    %230 = arith.addf %227, %229 : vector<4x512xf32>
    %231 = vector.extract_strided_slice %230 {offsets = [0, 0], sizes = [4, 48], strides = [1, 1]} : vector<4x512xf32> to vector<4x48xf32>
    %232 = arith.negf %231 : vector<4x48xf32>
    %233 = math.exp %232 : vector<4x48xf32>
    %cst_62 = arith.constant 1.000000e+00 : f32
    %234 = vector.broadcast %cst_62 : f32 to vector<4x48xf32>
    %235 = arith.addf %234, %233 : vector<4x48xf32>
    %236 = arith.divf %234, %235 : vector<4x48xf32>
    %237 = vector.extract_strided_slice %230 {offsets = [0, 128], sizes = [4, 48], strides = [1, 1]} : vector<4x512xf32> to vector<4x48xf32>
    %238 = arith.negf %237 : vector<4x48xf32>
    %239 = math.exp %238 : vector<4x48xf32>
    %cst_63 = arith.constant 1.000000e+00 : f32
    %240 = vector.broadcast %cst_63 : f32 to vector<4x48xf32>
    %241 = arith.addf %240, %239 : vector<4x48xf32>
    %242 = arith.divf %240, %241 : vector<4x48xf32>
    %243 = vector.extract_strided_slice %230 {offsets = [0, 256], sizes = [4, 48], strides = [1, 1]} : vector<4x512xf32> to vector<4x48xf32>
    %244 = math.tanh %243 : vector<4x48xf32>
    %245 = vector.extract_strided_slice %230 {offsets = [0, 384], sizes = [4, 48], strides = [1, 1]} : vector<4x512xf32> to vector<4x48xf32>
    %246 = arith.negf %245 : vector<4x48xf32>
    %247 = math.exp %246 : vector<4x48xf32>
    %cst_64 = arith.constant 1.000000e+00 : f32
    %248 = vector.broadcast %cst_64 : f32 to vector<4x48xf32>
    %249 = arith.addf %248, %247 : vector<4x48xf32>
    %250 = arith.divf %248, %249 : vector<4x48xf32>
    %251 = arith.mulf %242, %218 : vector<4x48xf32>
    %252 = arith.mulf %236, %244 : vector<4x48xf32>
    %253 = arith.addf %251, %252 : vector<4x48xf32>
    %254 = math.tanh %253 : vector<4x48xf32>
    %255 = arith.mulf %250, %254 : vector<4x48xf32>
    %256 = vector.extract_strided_slice %255 {offsets = [0, 0], sizes = [2, 48], strides = [1, 1]} : vector<4x48xf32> to vector<2x48xf32>
    %c12_65 = arith.constant 12 : index
    %c0_66 = arith.constant 0 : index
    %257 = vector.load %arg13[%c12_65, %c0_66] : memref<16x96xf32, #tpu.memory_space<vmem>>, vector<2x48xf32>
    tpu.vector_store %arg13[%c12_65, %c0_66], %256 {strides = array<i32>} : memref<16x96xf32, #tpu.memory_space<vmem>>, vector<2x48xf32>,
    %258 = vector.extract_strided_slice %255 {offsets = [2, 0], sizes = [2, 48], strides = [1, 1]} : vector<4x48xf32> to vector<2x48xf32>
    %c2_67 = arith.constant 2 : index
    %c48_68 = arith.constant 48 : index
    %259 = vector.load %arg13[%c2_67, %c48_68] : memref<16x96xf32, #tpu.memory_space<vmem>>, vector<2x48xf32>
    tpu.vector_store %arg13[%c2_67, %c48_68], %258 {strides = array<i32>} : memref<16x96xf32, #tpu.memory_space<vmem>>, vector<2x48xf32>,
    %260 = tpu.concatenate %255, %255 in 1 : vector<4x48xf32>, vector<4x48xf32> -> vector<4x96xf32>
    %261 = arith.mulf %14, %260 : vector<4x96xf32>
    %c28 = arith.constant 28 : index
    %c0_69 = arith.constant 0 : index
    %262 = vector.load %arg12[%c28, %c0_69] : memref<32x512xf32, #tpu.memory_space<vmem>>, vector<4x512xf32>
    %263 = arith.truncf %261 : vector<4x96xf32> to vector<4x96xbf16>
    %cst_70 = arith.constant dense<0.000000e+00> : vector<4x512xf32>
    %264 = tpu.matmul %263, %4, %cst_70 {dimension_numbers = #tpu.dot_dimension_numbers<[1], [0], [0], [1], [0, 0, 1, 1], [], []>} : vector<4x96xbf16>, vector<96x512xbf16>, vector<4x512xf32> -> vector<4x512xf32>
    %265 = arith.addf %262, %264 : vector<4x512xf32>
    %266 = vector.extract_strided_slice %265 {offsets = [0, 0], sizes = [4, 48], strides = [1, 1]} : vector<4x512xf32> to vector<4x48xf32>
    %267 = arith.negf %266 : vector<4x48xf32>
    %268 = math.exp %267 : vector<4x48xf32>
    %cst_71 = arith.constant 1.000000e+00 : f32
    %269 = vector.broadcast %cst_71 : f32 to vector<4x48xf32>
    %270 = arith.addf %269, %268 : vector<4x48xf32>
    %271 = arith.divf %269, %270 : vector<4x48xf32>
    %272 = vector.extract_strided_slice %265 {offsets = [0, 128], sizes = [4, 48], strides = [1, 1]} : vector<4x512xf32> to vector<4x48xf32>
    %273 = arith.negf %272 : vector<4x48xf32>
    %274 = math.exp %273 : vector<4x48xf32>
    %cst_72 = arith.constant 1.000000e+00 : f32
    %275 = vector.broadcast %cst_72 : f32 to vector<4x48xf32>
    %276 = arith.addf %275, %274 : vector<4x48xf32>
    %277 = arith.divf %275, %276 : vector<4x48xf32>
    %278 = vector.extract_strided_slice %265 {offsets = [0, 256], sizes = [4, 48], strides = [1, 1]} : vector<4x512xf32> to vector<4x48xf32>
    %279 = math.tanh %278 : vector<4x48xf32>
    %280 = vector.extract_strided_slice %265 {offsets = [0, 384], sizes = [4, 48], strides = [1, 1]} : vector<4x512xf32> to vector<4x48xf32>
    %281 = arith.negf %280 : vector<4x48xf32>
    %282 = math.exp %281 : vector<4x48xf32>
    %cst_73 = arith.constant 1.000000e+00 : f32
    %283 = vector.broadcast %cst_73 : f32 to vector<4x48xf32>
    %284 = arith.addf %283, %282 : vector<4x48xf32>
    %285 = arith.divf %283, %284 : vector<4x48xf32>
    %286 = arith.mulf %277, %253 : vector<4x48xf32>
    %287 = arith.mulf %271, %279 : vector<4x48xf32>
    %288 = arith.addf %286, %287 : vector<4x48xf32>
    %289 = math.tanh %288 : vector<4x48xf32>
    %290 = arith.mulf %285, %289 : vector<4x48xf32>
    %291 = vector.extract_strided_slice %290 {offsets = [0, 0], sizes = [2, 48], strides = [1, 1]} : vector<4x48xf32> to vector<2x48xf32>
    %c14_74 = arith.constant 14 : index
    %c0_75 = arith.constant 0 : index
    %292 = vector.load %arg13[%c14_74, %c0_75] : memref<16x96xf32, #tpu.memory_space<vmem>>, vector<2x48xf32>
    tpu.vector_store %arg13[%c14_74, %c0_75], %291 {strides = array<i32>} : memref<16x96xf32, #tpu.memory_space<vmem>>, vector<2x48xf32>,
    %293 = vector.extract_strided_slice %290 {offsets = [2, 0], sizes = [2, 48], strides = [1, 1]} : vector<4x48xf32> to vector<2x48xf32>
    %c0_76 = arith.constant 0 : index
    %c48_77 = arith.constant 48 : index
    %294 = vector.load %arg13[%c0_76, %c48_77] : memref<16x96xf32, #tpu.memory_space<vmem>>, vector<2x48xf32>
    tpu.vector_store %arg13[%c0_76, %c48_77], %293 {strides = array<i32>} : memref<16x96xf32, #tpu.memory_space<vmem>>, vector<2x48xf32>,
    %c0_78 = arith.constant 0 : index
    %c0_79 = arith.constant 0 : index
    %295 = vector.load %arg13[%c0_78, %c0_79] : memref<16x96xf32, #tpu.memory_space<vmem>>, vector<16x96xf32>
    %c14_80 = arith.constant 14 : index
    %c0_81 = arith.constant 0 : index
    %296 = vector.load %arg13[%c14_80, %c0_81] : memref<16x96xf32, #tpu.memory_space<vmem>>, vector<2x96xf32>
    %297 = arith.truncf %296 : vector<2x96xf32> to vector<2x96xbf16>
    %c0_82 = arith.constant 0 : index
    %c0_83 = arith.constant 0 : index
    %298 = vector.load %arg3[%c0_82, %c0_83] : memref<96x96xbf16, #tpu.memory_space<vmem>>, vector<96x96xbf16>
    %cst_84 = arith.constant dense<0.000000e+00> : vector<2x96xf32>
    %299 = tpu.matmul %297, %298, %cst_84 {dimension_numbers = #tpu.dot_dimension_numbers<[1], [0], [0], [1], [0, 0, 1, 1], [], []>} : vector<2x96xbf16>, vector<96x96xbf16>, vector<2x96xf32> -> vector<2x96xf32>
    %c0_85 = arith.constant 0 : index
    %c0_86 = arith.constant 0 : index
    %300 = vector.load %arg4[%c0_85, %c0_86] : memref<1x96xf32, #tpu.memory_space<vmem>>, vector<1x96xf32>
    %301 = vector.broadcast %300 : vector<1x96xf32> to vector<2x96xf32>
    %302 = arith.addf %299, %301 : vector<2x96xf32>
    %303 = arith.truncf %295 : vector<16x96xf32> to vector<16x96xbf16>
    %c0_87 = arith.constant 0 : index
    %c0_88 = arith.constant 0 : index
    %304 = vector.load %arg5[%c0_87, %c0_88] : memref<96x256xbf16, #tpu.memory_space<vmem>>, vector<96x256xbf16>
    %cst_89 = arith.constant dense<0.000000e+00> : vector<16x256xf32>
    %305 = tpu.matmul %303, %304, %cst_89 {dimension_numbers = #tpu.dot_dimension_numbers<[1], [0], [0], [1], [0, 0, 1, 1], [], []>} : vector<16x96xbf16>, vector<96x256xbf16>, vector<16x256xf32> -> vector<16x256xf32>
    %c0_90 = arith.constant 0 : index
    %c0_91 = arith.constant 0 : index
    %306 = vector.load %arg6[%c0_90, %c0_91] : memref<1x256xf32, #tpu.memory_space<vmem>>, vector<1x256xf32>
    %307 = vector.broadcast %306 : vector<1x256xf32> to vector<16x256xf32>
    %308 = arith.addf %305, %307 : vector<16x256xf32>
    %309 = vector.extract_strided_slice %308 {offsets = [0, 0], sizes = [16, 96], strides = [1, 1]} : vector<16x256xf32> to vector<16x96xf32>
    %310 = vector.extract_strided_slice %308 {offsets = [0, 128], sizes = [16, 96], strides = [1, 1]} : vector<16x256xf32> to vector<16x96xf32>
    %cst_92 = arith.constant 9.600000e+01 : f32
    %311 = math.sqrt %cst_92 : f32
    %cst_93 = arith.constant 1.000000e+00 : f32
    %312 = arith.divf %cst_93, %311 : f32
    %cst_94 = arith.constant dense<0.000000e+00> : vector<2x16xf32>
    %313 = tpu.matmul %302, %309, %cst_94 {dimension_numbers = #tpu.dot_dimension_numbers<[1], [1], [0], [0], [0, 0, 1, 0], [], []>} : vector<2x96xf32>, vector<16x96xf32>, vector<2x16xf32> -> vector<2x16xf32>
    %314 = vector.broadcast %312 : f32 to vector<2x16xf32>
    %315 = arith.mulf %313, %314 : vector<2x16xf32>
    %316 = tpu.iota {dimensions = array<i32: 1>} : vector<2x16xi32>
    %317 = tpu.iota {dimensions = array<i32: 0>} : vector<2x16xi32>
    %c2_i32_95 = arith.constant 2 : i32
    %c0_i32 = arith.constant 0 : i32
    %318 = arith.cmpi eq, %c2_i32_95, %c0_i32 : i32
    %c1_i32 = arith.constant 1 : i32
    %319 = arith.select %318, %c1_i32, %c2_i32_95 : i32
    %320 = vector.broadcast %319 : i32 to vector<2x16xi32>
    %321 = arith.remsi %316, %320 : vector<2x16xi32>
    %c0_i32_96 = arith.constant 0 : i32
    %322 = vector.broadcast %c0_i32_96 : i32 to vector<2x16xi32>
    %323 = arith.cmpi ne, %321, %322 : vector<2x16xi32>
    %c0_i32_97 = arith.constant 0 : i32
    %324 = vector.broadcast %c0_i32_97 : i32 to vector<2x16xi32>
    %325 = arith.cmpi slt, %321, %324 : vector<2x16xi32>
    %c0_i32_98 = arith.constant 0 : i32
    %326 = arith.cmpi slt, %319, %c0_i32_98 : i32
    %327 = vector.broadcast %326 : i1 to vector<2x16xi1>
    %328 = vector.broadcast %327 : vector<2x16xi1> to vector<2x16xi1>
    %329 = arith.xori %325, %328 : vector<2x16xi1>
    %330 = arith.andi %329, %323 : vector<2x16xi1>
    %331 = vector.broadcast %319 : i32 to vector<2x16xi32>
    %332 = arith.addi %321, %331 : vector<2x16xi32>
    %333 = arith.select %330, %332, %321 : vector<2x16xi1>, vector<2x16xi32>
    %334 = arith.cmpi eq, %333, %317 : vector<2x16xi32>
    %cst_99 = arith.constant -1.000000e+30 : f32
    %335 = vector.broadcast %cst_99 : f32 to vector<2x16xf32>
    %336 = arith.select %334, %315, %335 : vector<2x16xi1>, vector<2x16xf32>
    %cst_100 = arith.constant dense<0xFF800000> : vector<2xf32>
    %337 = vector.multi_reduction <maximumf>, %336, %cst_100 [1] : vector<2x16xf32> to vector<2xf32>
    %338 = vector.shape_cast %337 : vector<2xf32> to vector<2x1xf32>
    %339 = vector.broadcast %338 : vector<2x1xf32> to vector<2x16xf32>
    %340 = arith.subf %336, %339 : vector<2x16xf32>
    %341 = math.exp %340 : vector<2x16xf32>
    %cst_101 = arith.constant dense<0.000000e+00> : vector<2xf32>
    %342 = vector.multi_reduction <add>, %341, %cst_101 [1] : vector<2x16xf32> to vector<2xf32>
    %343 = vector.shape_cast %342 : vector<2xf32> to vector<2x1xf32>
    %344 = tpu.reciprocal %343 {approx = true} : vector<2x1xf32> -> vector<2x1xf32>
    %345 = vector.broadcast %344 : vector<2x1xf32> to vector<2x16xf32>
    %346 = arith.mulf %341, %345 : vector<2x16xf32>
    %cst_102 = arith.constant dense<0.000000e+00> : vector<2x96xf32>
    %347 = tpu.matmul %346, %310, %cst_102 {dimension_numbers = #tpu.dot_dimension_numbers<[1], [0], [0], [1], [0, 0, 1, 1], [], []>} : vector<2x16xf32>, vector<16x96xf32>, vector<2x96xf32> -> vector<2x96xf32>
    %348 = arith.truncf %347 : vector<2x96xf32> to vector<2x96xbf16>
    %c0_103 = arith.constant 0 : index
    %c0_104 = arith.constant 0 : index
    %349 = vector.load %arg7[%c0_103, %c0_104] : memref<96x96xbf16, #tpu.memory_space<vmem>>, vector<96x96xbf16>
    %cst_105 = arith.constant dense<0.000000e+00> : vector<2x96xf32>
    %350 = tpu.matmul %348, %349, %cst_105 {dimension_numbers = #tpu.dot_dimension_numbers<[1], [0], [0], [1], [0, 0, 1, 1], [], []>} : vector<2x96xbf16>, vector<96x96xbf16>, vector<2x96xf32> -> vector<2x96xf32>
    %c0_106 = arith.constant 0 : index
    %c0_107 = arith.constant 0 : index
    %351 = vector.load %arg8[%c0_106, %c0_107] : memref<1x96xf32, #tpu.memory_space<vmem>>, vector<1x96xf32>
    %352 = vector.broadcast %351 : vector<1x96xf32> to vector<2x96xf32>
    %353 = arith.addf %350, %352 : vector<2x96xf32>
    %cst_108 = arith.constant 0.000000e+00 : f32
    %354 = vector.broadcast %cst_108 : f32 to vector<2x96xf32>
    %355 = arith.maximumf %353, %354 : vector<2x96xf32>
    %356 = arith.truncf %355 : vector<2x96xf32> to vector<2x96xbf16>
    %c0_109 = arith.constant 0 : index
    %c0_110 = arith.constant 0 : index
    %357 = vector.load %arg9[%c0_109, %c0_110] : memref<96x128xbf16, #tpu.memory_space<vmem>>, vector<96x128xbf16>
    %cst_111 = arith.constant dense<0.000000e+00> : vector<2x128xf32>
    %358 = tpu.matmul %356, %357, %cst_111 {dimension_numbers = #tpu.dot_dimension_numbers<[1], [0], [0], [1], [0, 0, 1, 1], [], []>} : vector<2x96xbf16>, vector<96x128xbf16>, vector<2x128xf32> -> vector<2x128xf32>
    %c0_112 = arith.constant 0 : index
    %c0_113 = arith.constant 0 : index
    %359 = vector.load %arg10[%c0_112, %c0_113] : memref<1x128xf32, #tpu.memory_space<vmem>>, vector<1x128xf32>
    %360 = vector.broadcast %359 : vector<1x128xf32> to vector<2x128xf32>
    %361 = arith.addf %358, %360 : vector<2x128xf32>
    %c0_114 = arith.constant 0 : index
    %c0_115 = arith.constant 0 : index
    %362 = vector.load %arg11[%c0_114, %c0_115] : memref<2x128xf32, #tpu.memory_space<vmem>>, vector<2x128xf32>
    tpu.vector_store %arg11[%c0_114, %c0_115], %361 {strides = array<i32>} : memref<2x128xf32, #tpu.memory_space<vmem>>, vector<2x128xf32>,
    return
  }
}

</mosaic_0001>

<bundles_post_ra>
// kernel: lotto_forward.1
= control target key start
LH: loop header
LB: loop body
LE: loop exit
PB: predicated region body
PF: predicated region fallthrough
CT: control target
= control target key end

     0   :  { %16 = vsyncpa [#allocation5], 0  ;;  %s3407_s0 = inlined_call_operand.vmem [shape: bf16[32,62], index: 0, kind: input, shape index: {}]   ;;  %s3408_s1 = inlined_call_operand.vmem [shape: bf16[62,512], index: 1, kind: input, shape index: {}]   ;;  %s3409_s2 = inlined_call_operand.hbm [shape: bf16[96,512], index: 2, kind: input, shape index: {}]   ;;  %s3410_s3 = inlined_call_operand.hbm [shape: bf16[96,96], index: 3, kind: input, shape index: {}]   ;;  %s3411_s4 = inlined_call_operand.vmem [shape: f32[1,96], index: 4, kind: input, shape index: {}]   ;;  %s3412_s5 = inlined_call_operand.hbm [shape: bf16[96,256], index: 5, kind: input, shape index: {}]   ;;  %s3413_s6 = inlined_call_operand.vmem [shape: f32[1,256], index: 6, kind: input, shape index: {}]   ;;  %s3414_s7 = inlined_call_operand.hbm [shape: bf16[96,96], index: 7, kind: input, shape index: {}]   ;;  %s3415_s8 = inlined_call_operand.vmem [shape: f32[1,96], index: 8, kind: input, shape index: {}]   ;;  %s3416_s9 = inlined_call_operand.hbm [shape: bf16[96,128], index: 9, kind: input, shape index: {}]   ;;  %s3417_s10 = inlined_call_operand.vmem [shape: f32[1,128], index: 10, kind: input, shape index: {}]   ;;  %s3418_s11 = inlined_call_operand.hbm [shape: f32[2,128], index: 11, kind: output, shape index: {}]  }
   0x1   :  { %17 = vsyncpa [#allocation8], 0 }
   0x2   :  { %18 = vsyncpa [#allocation11], 0  ;;  %s41_s19 = sshll.u32 %s3410_s3, 4  ;;  %s42_s19 = int_to_ptr.hbm [resolvable:$true] %s41_s19 }
   0x3   :  { %19 = vsyncpa [#allocation6], 0  ;;  %s2805_s20 = smov [#allocation7]   ;;  %s71_s24 = sshll.u32 %s3414_s7, 4  ;;  %s72_s24 = int_to_ptr.hbm [resolvable:$true] %s71_s24 }
   0x4   :  { %s43_s21 = sshll.u32 %s2805_s20, 4  ;;  %s2806_s25 = smov 64   ;;  %s44_s21 = int_to_ptr.vmem [resolvable:$true] %s43_s21 }
   0x5   :  { %s2807_s26 = smov 4   ;;  %s2808_s27 = smov [#allocation10]  }
   0x6   :  { %49 = dma.hbm_to_vmem [thread:$0]  %s42_s19, 768, %s44_s21, [#allocation8], %s2806_s25, %s2806_s25, %s2807_s26  }
   0x7   :  { %s73_s28 = sshll.u32 %s2808_s27, 4  ;;  %s28_s30 = sshll.u32 %s3409_s2, 4  ;;  %s74_s28 = int_to_ptr.vmem [resolvable:$true] %s73_s28  ;;  %s29_s30 = int_to_ptr.hbm [resolvable:$true] %s28_s30 }
   0x8   :  { %79 = dma.hbm_to_vmem [thread:$0]  %s72_s24, 768, %s74_s28, [#allocation11], %s2806_s25, %s2806_s25, %s2807_s26  }
   0x9   :  { %s2809_s7 = smov [#allocation4]   ;;  %s56_s15 = sshll.u32 %s3412_s5, 4  ;;  %s57_s15 = int_to_ptr.hbm [resolvable:$true] %s56_s15 }
   0xa   :  { %s30_s12 = sshll.u32 %s2809_s7, 4  ;;  %s2810_s16 = smov 256   ;;  %s31_s12 = int_to_ptr.vmem [resolvable:$true] %s30_s12 }
   0xb   :  { %s2811_s17 = smov 16   ;;  %s2812_s18 = smov [#allocation9]  }
   0xc   :  { %36 = dma.hbm_to_vmem [thread:$0]  %s29_s30, 3072, %s31_s12, [#allocation5], %s2810_s16, %s2810_s16, %s2811_s17  }
   0xd   :  { %s58_s19 = sshll.u32 %s2812_s18, 4  ;;  %s2813_s2 = smov 128   ;;  %s59_s19 = int_to_ptr.vmem [resolvable:$true] %s58_s19 }
   0xe   :  { %s2814_s20 = smov 8   ;;  %s86_s23 = sshll.u32 %s3416_s9, 4  ;;  %s87_s23 = int_to_ptr.hbm [resolvable:$true] %s86_s23 }
   0xf   :  { %64 = dma.hbm_to_vmem [thread:$0]  %s57_s15, 1536, %s59_s19, [#allocation8], %s2813_s2, %s2813_s2, %s2814_s20  }
  0x10   :  { %s2815_s24 = smov [#allocation12]  }
  0x11   :  { %s88_s27 = sshll.u32 %s2815_s24, 4  ;;  %s89_s27 = int_to_ptr.vmem [resolvable:$true] %s88_s27 }
  0x12   :  { %94 = dma.hbm_to_vmem [thread:$0]  %s87_s23, 768, %s89_s27, [#allocation11], %s2806_s25, %s2806_s25, %s2807_s26  }
  0x13   :  { %2797 = dma.done.wait [#allocation5], 3072  }
  0x14   :  { %2798 = vsyncadd [#allocation5], 4294964224 }
  0x15   :  { %2799 = dma.done.wait [#allocation8], 2304  }
  0x16   :  { %2800 = vsyncadd [#allocation8], 4294964992 }
  0x17   :  { %2801 = dma.done.wait [#allocation11], 1536  }
  0x18   :  { %2802 = vsyncadd [#allocation11], 4294965760  ;;  %vm231_vm0 = vcmask 1046528   ;;  %v2444_v0 = vld [vmem:[%s3408_s1 + $0x64] sm:$0xf]  ;;  %vm224_vm1 = vcmask 506880  }
  0x19   :  { %v2132_v1 = vld [vmem:[%s3408_s1 + $0x70] sm:$0x70]  ;;  %v2445_v2 = vld [vmem:[%s3408_s1 + $0x6c] sm:$0xf]  ;;  %v2140_v4 = vld [vmem:[%s3408_s1 + $0x78] sm:$0x70] }
  0x1a   :  { %v2135_v3 = vor.u32 %v2444_v0, %v2132_v1  ;;  %v2138_v5 = vld [vmem:[%s3408_s1 + $0x68] sm:$0xf]  ;;  %v2447_v6 = vld [vmem:[%s3408_s1 + $0x74] sm:$0x70]  ;;  %v2143_v7 = vor.u32 %v2445_v2, %v2140_v4  ;;  %v2440_v9 = vld [vmem:[%s3408_s1 + $0x44] sm:$0xf] }
  0x1b   :  { %v2139_v8 = vor.u32 %v2447_v6, %v2138_v5  ;;  %v2116_v10 = vld [vmem:[%s3408_s1 + $0x50] sm:$0xf0]  ;;  %v2441_v11 = vld [vmem:[%s3408_s1 + $0x4c] sm:$0xf]  ;;  %v2124_v13 = vld [vmem:[%s3408_s1 + $0x58] sm:$0xf0] }
  0x1c   :  { %v236_v12 = vsel %vm231_vm0, %v2135_v3, 0  ;;  %v2122_v14 = vld [vmem:[%s3408_s1 + $0x48] sm:$0xf]  ;;  %v242_v15 = vsel %vm231_vm0, %v2143_v7, 0  ;;  %v2119_v17 = vor.u32 %v2440_v9, %v2116_v10  ;;  %v2443_v18 = vld [vmem:[%s3408_s1 + $0x54] sm:$0xf0]  ;;  %v2127_v19 = vor.u32 %v2441_v11, %v2124_v13 }
  0x1d   :  { %267 = vmatpush.bf16.msra.mxu1 %v236_v12  ;;  %v239_v16 = vsel %vm231_vm0, %v2139_v8, 0  ;;  %305 = vmatpush.bf16.msra.mxu3 %v242_v15  ;;  %v2123_v20 = vor.u32 %v2443_v18, %v2122_v14  ;;  %v2436_v21 = vld [vmem:[%s3408_s1 + $0x24] sm:$0xf]  ;;  %v2100_v22 = vld [vmem:[%s3408_s1 + $0x30] sm:$0xf0]  ;;  %vm617_vm14 = vcmask 386048  }
  0x1e   :  { %286 = vmatpush.bf16.msra.mxu2 %v239_v16  ;;  %v2437_v23 = vld [vmem:[%s3408_s1 + $0x2c] sm:$0xf]  ;;  %v2108_v24 = vld [vmem:[%s3408_s1 + $0x38] sm:$0xf0]  ;;  %v2106_v25 = vld [vmem:[%s3408_s1 + $0x28] sm:$0xf]  ;;  %v2103_v27 = vor.u32 %v2436_v21, %v2100_v22 }
  0x1f   :  { %v2439_v26 = vld [vmem:[%s3408_s1 + $0x34] sm:$0xf0]  ;;  %v2432_v28 = vld [vmem:[%s3408_s1 + $0x4] sm:$0xf]  ;;  %v2084_v29 = vld [vmem:[%s3408_s1 + $0x10] sm:$0xf0]  ;;  %v2111_v31 = vor.u32 %v2437_v23, %v2108_v24 }
  0x20   :  { %v2433_v30 = vld [vmem:[%s3408_s1 + $0xc] sm:$0xf]  ;;  %v2107_v32 = vor.u32 %v2439_v26, %v2106_v25  ;;  %v2092_v33 = vld [vmem:[%s3408_s1 + $0x18] sm:$0xf0]  ;;  %v2090_v34 = vld [vmem:[%s3408_s1 + $0x8] sm:$0xf]  ;;  %v2087_v42 = vor.u32 %v2432_v28, %v2084_v29 }
  0x21   :  { %268 = vmatpush.bf16.msra.mxu1 %v2119_v17  ;;  %306 = vmatpush.bf16.msra.mxu3 %v2127_v19  ;;  %v2435_v35 = vld [vmem:[%s3408_s1 + $0x14] sm:$0xf0]  ;;  %v2235_v36 = vld [vmem:[#allocation4 + $0xa0] sm:$0xf]  ;;  %v2470_v37 = vld [vmem:[#allocation4 + $0xac] sm:$0xf0]  ;;  %v2095_v46 = vor.u32 %v2433_v30, %v2092_v33 }
  0x22   :  { %287 = vmatpush.bf16.msra.mxu2 %v2123_v20  ;;  %v2468_v38 = vld [vmem:[#allocation4 + $0xa4] sm:$0xf]  ;;  %v2237_v39 = vld [vmem:[#allocation4 + $0xb0] sm:$0xf0]  ;;  %v2130_v40 = vld [vmem:[%s3408_s1 + $0x60] sm:$0xf]  ;;  %v2091_v47 = vor.u32 %v2435_v35, %v2090_v34  ;;  %v2991_v50 = vor.u32 %v2470_v37, %v2235_v36 }
  0x23   :  { %v2446_v41 = vld [vmem:[%s3408_s1 + $0x6c] sm:$0x70]  ;;  %v2243_v43 = vld [vmem:[#allocation4 + $0xa8] sm:$0xf]  ;;  %v2471_v44 = vld [vmem:[#allocation4 + $0xb4] sm:$0xf0]  ;;  %v2993_v51 = vor.u32 %v2468_v38, %v2237_v39 }
  0x24   :  { %v2131_v45 = vor.u32 %v2446_v41, %v2130_v40  ;;  %v2219_v48 = vld [vmem:[#allocation4 + $0x80] sm:$0xf]  ;;  %v2989_v49 = vld [vmem:[%s3407_s0] sm:$0xff]  ;;  %v3002_v56 = vor.u32 %v2471_v44, %v2243_v43  ;;  %v2464_v57 = vld [vmem:[#allocation4 + $0x84] sm:$0xf]  ;;  %s2820_s28 = smov [#allocation13]  }
  0x25   :  { %269 = vmatpush.bf16.msra.mxu1 %v2103_v27  ;;  %307 = vmatpush.bf16.msra.mxu3 %v2111_v31  ;;  %v2114_v53 = vld [vmem:[%s3408_s1 + $0x40] sm:$0xf]  ;;  %v2442_v54 = vld [vmem:[%s3408_s1 + $0x4c] sm:$0xf0]  ;;  %v2221_v58 = vld [vmem:[#allocation4 + $0x90] sm:$0xf0] }
  0x26   :  { %288 = vmatpush.bf16.msra.mxu2 %v2107_v32  ;;  %v233_v52 = vsel %vm231_vm0, %v2131_v45, 0  ;;  %v2466_v55 = vld [vmem:[#allocation4 + $0x8c] sm:$0xf0]  ;;  %v2227_v59 = vld [vmem:[#allocation4 + $0x88] sm:$0xf]  ;;  %v2115_v61 = vor.u32 %v2442_v54, %v2114_v53  ;;  %v3008_v0 = vor.u32 %v2464_v57, %v2221_v58  ;;  %v2431_v31 = vld [vmem:[%s3407_s0 + $0x8] sm:$0xff] }
  0x27   :  { %248 = vmatpush.bf16.msra.mxu0 %v233_v52  ;;  %v2467_v60 = vld [vmem:[#allocation4 + $0x94] sm:$0xf0]  ;;  %v3005_v62 = vor.u32 %v2466_v55, %v2219_v48  ;;  %v2203_v63 = vld [vmem:[#allocation4 + $0x60] sm:$0xf]  ;;  %v2098_v1 = vld [vmem:[%s3408_s1 + $0x20] sm:$0xf] }
  0x28   :  { %v2438_v2 = vld [vmem:[%s3408_s1 + $0x2c] sm:$0xf0]  ;;  %v2462_v3 = vld [vmem:[#allocation4 + $0x6c] sm:$0xf0]  ;;  %v3019_v4 = vor.u32 %v2467_v60, %v2227_v59  ;;  %v2460_v5 = vld [vmem:[#allocation4 + $0x64] sm:$0xf] }
  0x29   :  { %270 = vmatpush.bf16.msra.mxu1 %v2087_v42  ;;  %308 = vmatpush.bf16.msra.mxu3 %v2095_v46  ;;  %v2205_v6 = vld [vmem:[#allocation4 + $0x70] sm:$0xf0]  ;;  %v2211_v7 = vld [vmem:[#allocation4 + $0x68] sm:$0xf]  ;;  %v2463_v8 = vld [vmem:[#allocation4 + $0x74] sm:$0xf0]  ;;  %v2099_v9 = vor.u32 %v2438_v2, %v2098_v1  ;;  %v3026_v10 = vor.u32 %v2462_v3, %v2203_v63 }
  0x2a   :  { %289 = vmatpush.bf16.msra.mxu2 %v2091_v47  ;;  %v2187_v11 = vld [vmem:[#allocation4 + $0x40] sm:$0xf]  ;;  %v3029_v12 = vor.u32 %v2460_v5, %v2205_v6  ;;  %v2082_v13 = vld [vmem:[%s3408_s1] sm:$0xf]  ;;  %v3038_v16 = vor.u32 %v2463_v8, %v2211_v7  ;;  %v2456_v17 = vld [vmem:[#allocation4 + $0x44] sm:$0xf] }
  0x2b   :  { %249 = vmatpush.bf16.msra.mxu0 %v2115_v61  ;;  %v2434_v14 = vld [vmem:[%s3408_s1 + $0xc] sm:$0xf0]  ;;  %v2458_v15 = vld [vmem:[#allocation4 + $0x4c] sm:$0xf0]  ;;  %v2189_v18 = vld [vmem:[#allocation4 + $0x50] sm:$0xf0] }
  0x2c   :  { %2146 = vmatmul.msk.bf16.vlgmr.msra.gmra.mxu1 %vm224_vm1, %v2989_v49  ;;  %2150 = vmatmul.msk.bf16.vlgmr.msra.gmra.mxu3 %vm224_vm1, %v2989_v49  ;;  %v2195_v19 = vld [vmem:[#allocation4 + $0x48] sm:$0xf]  ;;  %v2459_v20 = vld [vmem:[#allocation4 + $0x54] sm:$0xf0]  ;;  %v2083_v21 = vor.u32 %v2434_v14, %v2082_v13  ;;  %v3041_v22 = vor.u32 %v2458_v15, %v2187_v11  ;;  %v2171_v23 = vld [vmem:[#allocation4 + $0x20] sm:$0xf]  ;;  %v3044_v25 = vor.u32 %v2456_v17, %v2189_v18 }
  0x2d   :  { %500 = vmatpush.bf16.msrb.mxu3 %v2991_v50  ;;  %513 = vmatpush.bf16.msrb.mxu1 %v2993_v51  ;;  %v2454_v24 = vld [vmem:[#allocation4 + $0x2c] sm:$0xf0]  ;;  %v2452_v26 = vld [vmem:[#allocation4 + $0x24] sm:$0xf]  ;;  %v3047_v27 = vor.u32 %v2459_v20, %v2195_v19  ;;  %v2173_v28 = vld [vmem:[#allocation4 + $0x30] sm:$0xf0] }
  0x2e   :  { %526 = vmatpush.bf16.msrb.mxu2 %v3002_v56  ;;  %v2179_v29 = vld [vmem:[#allocation4 + $0x28] sm:$0xf]  ;;  %v2455_v30 = vld [vmem:[#allocation4 + $0x34] sm:$0xf0]  ;;  %v3053_v32 = vor.u32 %v2454_v24, %v2171_v23  ;;  %v2155_v33 = vld [vmem:[#allocation4] sm:$0xf]  ;;  %v3056_v35 = vor.u32 %v2452_v26, %v2173_v28 }
  0x2f   :  { %2148 = vmatmul.msk.bf16.vlgmr.msra.gmra.mxu2 %vm224_vm1, %v2989_v49  ;;  %250 = vmatpush.bf16.msra.mxu0 %v2099_v9  ;;  %v2450_v34 = vld [vmem:[#allocation4 + $0xc] sm:$0xf0]  ;;  %v2469_v36 = vld [vmem:[#allocation4 + $0xac] sm:$0xf]  ;;  %v3059_v37 = vor.u32 %v2455_v30, %v2179_v29  ;;  %v2448_v38 = vld [vmem:[#allocation4 + $0x4] sm:$0xf] }
  0x30   :  { %v2157_v39 = vld [vmem:[#allocation4 + $0x10] sm:$0xf0]  ;;  %v2245_v40 = vld [vmem:[#allocation4 + $0xb8] sm:$0xf0]  ;;  %v2163_v41 = vld [vmem:[#allocation4 + $0x8] sm:$0xf]  ;;  %v3065_v43 = vor.u32 %v2450_v34, %v2155_v33 }
  0x31   :  { %501 = vmatpush.bf16.msrb.mxu3 %v3005_v62  ;;  %514 = vmatpush.bf16.msrb.mxu1 %v3008_v0  ;;  %v2451_v42 = vld [vmem:[#allocation4 + $0x14] sm:$0xf0]  ;;  %v3068_v44 = vor.u32 %v2448_v38, %v2157_v39  ;;  %v3071_v45 = vor.u32 %v2469_v36, %v2245_v40  ;;  %v2465_v47 = vld [vmem:[#allocation4 + $0x8c] sm:$0xf]  ;;  %v2229_v48 = vld [vmem:[#allocation4 + $0x98] sm:$0xf0] }
  0x32   :  { %527 = vmatpush.bf16.msrb.mxu2 %v3019_v4  ;;  %v3074_v46 = vor.u32 %v2451_v42, %v2163_v41  ;;  %v2461_v52 = vld [vmem:[#allocation4 + $0x6c] sm:$0xf]  ;;  %v2213_v53 = vld [vmem:[#allocation4 + $0x78] sm:$0xf0]  ;;  %v2816_v61 = vmov 0   ;;  %s2817_s0 = smov 48  }
  0x33   :  { %251 = vmatpush.bf16.msra.mxu0 %v2083_v21  ;;  %v3089_v54 = vor.u32 %v2461_v52, %v2213_v53  ;;  %v2457_v55 = vld [vmem:[#allocation4 + $0x4c] sm:$0xf]  ;;  %v2197_v57 = vld [vmem:[#allocation4 + $0x58] sm:$0xf0]  ;;  %s2058_s9 = sshll.u32 %s2820_s28, 4  ;;  %s2060_s30 = sshll.u32 %s3418_s11, 4  ;;  %s2059_s9 = int_to_ptr.vmem [resolvable:$true] %s2058_s9  ;;  %s2061_s30 = int_to_ptr.hbm [resolvable:$true] %s2060_s30 }
  0x34   :  { %v3095_v58 = vor.u32 %v2457_v55, %v2197_v57  ;;  %v2453_v59 = vld [vmem:[#allocation4 + $0x2c] sm:$0xf]  ;;  %v2181_v60 = vld [vmem:[#allocation4 + $0x38] sm:$0xf0] }
  0x35   :  { %502 = vmatpush.bf16.msrb.mxu3 %v3026_v10  ;;  %515 = vmatpush.bf16.msrb.mxu1 %v3029_v12  ;;  %v3102_v63 = vor.u32 %v2453_v59, %v2181_v60  ;;  %v2449_v1 = vld [vmem:[#allocation4 + $0xc] sm:$0xf]  ;;  %v2165_v2 = vld [vmem:[#allocation4 + $0x18] sm:$0xf0] }
  0x36   :  { %528 = vmatpush.bf16.msrb.mxu2 %v3038_v16  ;;  %2144 = vmatmul.msk.bf16.vlgmr.msra.gmra.mxu0 %vm224_vm1, %v2989_v49  ;;  %v3082_v49 = vor.u32 %v2465_v47, %v2229_v48  ;;  %v3108_v3 = vor.u32 %v2449_v1, %v2165_v2 }
  0x37   :  { %638 = vmatpush.bf16.msrb.mxu0 %v2991_v50 }
  0x39   :  { %503 = vmatpush.bf16.msrb.mxu3 %v3041_v22  ;;  %516 = vmatpush.bf16.msrb.mxu1 %v3044_v25 }
  0x3a   :  { %529 = vmatpush.bf16.msrb.mxu2 %v3047_v27 }
  0x3b   :  { %639 = vmatpush.bf16.msrb.mxu0 %v3005_v62 }
  0x3c   :  { %2147 = vmatmul.msk.bf16.gmra.mxu1 %vm224_vm1, %v2431_v31  ;;  %2151 = vmatmul.msk.bf16.gmra.mxu3 %vm224_vm1, %v2431_v31 }
  0x3d   :  { %504 = vmatpush.bf16.msrb.mxu3 %v3053_v32  ;;  %517 = vmatpush.bf16.msrb.mxu1 %v3056_v35 }
  0x3e   :  { %530 = vmatpush.bf16.msrb.mxu2 %v3059_v37 }
  0x3f   :  { %2149 = vmatmul.msk.bf16.gmra.mxu2 %vm224_vm1, %v2431_v31  ;;  %640 = vmatpush.bf16.msrb.mxu0 %v3026_v10 }
  0x41   :  { %505 = vmatpush.bf16.msrb.mxu3 %v3065_v43  ;;  %518 = vmatpush.bf16.msrb.mxu1 %v3068_v44 }
  0x42   :  { %531 = vmatpush.bf16.msrb.mxu2 %v3074_v46 }
  0x43   :  { %641 = vmatpush.bf16.msrb.mxu0 %v3041_v22 }
  0x45   :  { %539 = vmatpush.bf16.msra.mxu3 %v3071_v45  ;;  %651 = vmatpush.bf16.msra.mxu1 %v2993_v51 }
  0x46   :  { %664 = vmatpush.bf16.msra.mxu2 %v3002_v56  ;;  %2145 = vmatmul.msk.bf16.gmra.mxu0 %vm224_vm1, %v2431_v31 }
  0x47   :  { %642 = vmatpush.bf16.msrb.mxu0 %v3053_v32 }
  0x49   :  { %540 = vmatpush.bf16.msra.mxu3 %v3082_v49  ;;  %652 = vmatpush.bf16.msra.mxu1 %v3008_v0 }
  0x4a   :  { %665 = vmatpush.bf16.msra.mxu2 %v3019_v4 }
  0x4b   :  { %643 = vmatpush.bf16.msrb.mxu0 %v3065_v43 }
  0x4c   :  { %519 = vmatmul.bf16.vlgmr.msrb.gmra.mxu1 %v2816_v61  ;;  %506 = vmatmul.bf16.vlgmr.msrb.gmra.mxu3 %v2816_v61 }
  0x4d   :  { %541 = vmatpush.bf16.msra.mxu3 %v3089_v54  ;;  %653 = vmatpush.bf16.msra.mxu1 %v3029_v12 }
  0x4e   :  { %666 = vmatpush.bf16.msra.mxu2 %v3038_v16 }
  0x4f   :  { %532 = vmatmul.bf16.vlgmr.msrb.gmra.mxu2 %v2816_v61  ;;  %793 = vmatpush.bf16.msra.mxu0 %v2991_v50 }
  0x51   :  { %542 = vmatpush.bf16.msra.mxu3 %v3095_v58  ;;  %654 = vmatpush.bf16.msra.mxu1 %v3044_v25 }
  0x52   :  { %667 = vmatpush.bf16.msra.mxu2 %v3047_v27 }
  0x53   :  { %794 = vmatpush.bf16.msra.mxu0 %v3005_v62 }
  0x55   :  { %543 = vmatpush.bf16.msra.mxu3 %v3102_v63  ;;  %655 = vmatpush.bf16.msra.mxu1 %v3056_v35 }
  0x56   :  { %668 = vmatpush.bf16.msra.mxu2 %v3059_v37 }
  0x57   :  { %795 = vmatpush.bf16.msra.mxu0 %v3026_v10 }
  0x59   :  { %544 = vmatpush.bf16.msra.mxu3 %v3108_v3  ;;  %656 = vmatpush.bf16.msra.mxu1 %v3068_v44 }
  0x5a   :  { %669 = vmatpush.bf16.msra.mxu2 %v3074_v46 }
  0x5b   :  { %796 = vmatpush.bf16.msra.mxu0 %v3041_v22 }
  0x5c   :  { %545 = vmatmul.bf16.vlgmr.msra.gmra.mxu3 %v2816_v61 }
  0x5d   :  { %677 = vmatpush.bf16.msrb.mxu3 %v3071_v45  ;;  %806 = vmatpush.bf16.msrb.mxu1 %v2993_v51 }
  0x5e   :  { %819 = vmatpush.bf16.msrb.mxu2 %v3002_v56 }
  0x5f   :  { %797 = vmatpush.bf16.msra.mxu0 %v3053_v32 }
  0x61   :  { %678 = vmatpush.bf16.msrb.mxu3 %v3082_v49  ;;  %807 = vmatpush.bf16.msrb.mxu1 %v3008_v0 }
  0x62   :  { %820 = vmatpush.bf16.msrb.mxu2 %v3019_v4 }
  0x63   :  { %798 = vmatpush.bf16.msra.mxu0 %v3065_v43 }
  0x65   :  { %679 = vmatpush.bf16.msrb.mxu3 %v3089_v54  ;;  %808 = vmatpush.bf16.msrb.mxu1 %v3029_v12 }
  0x66   :  { %821 = vmatpush.bf16.msrb.mxu2 %v3038_v16 }
  0x69   :  { %680 = vmatpush.bf16.msrb.mxu3 %v3095_v58  ;;  %809 = vmatpush.bf16.msrb.mxu1 %v3044_v25 }
  0x6a   :  { %822 = vmatpush.bf16.msrb.mxu2 %v3047_v27 }
  0x6d   :  { %681 = vmatpush.bf16.msrb.mxu3 %v3102_v63  ;;  %810 = vmatpush.bf16.msrb.mxu1 %v3056_v35 }
  0x6e   :  { %823 = vmatpush.bf16.msrb.mxu2 %v3059_v37 }
  0x71   :  { %682 = vmatpush.bf16.msrb.mxu3 %v3108_v3  ;;  %811 = vmatpush.bf16.msrb.mxu1 %v3068_v44 }
  0x72   :  { %824 = vmatpush.bf16.msrb.mxu2 %v3074_v46 }
  0x75   :  { %832 = vmatpush.bf16.msra.mxu3 %v3071_v45 }
  0x79   :  { %833 = vmatpush.bf16.msra.mxu3 %v3082_v49 }
  0x7d   :  { %834 = vmatpush.bf16.msra.mxu3 %v3089_v54 }
  0x81   :  { %835 = vmatpush.bf16.msra.mxu3 %v3095_v58 }
  0x85   :  { %836 = vmatpush.bf16.msra.mxu3 %v3102_v63 }
  0x89   :  { %837 = vmatpush.bf16.msra.mxu3 %v3108_v3 }
  0xa9   :  { %v272_v5 = vpop.f32.mrf.mxu1 }
  0xaa   :  { %321 = vst [vmem:[#allocation2] sm:$0xff] %v272_v5 }
  0xaf   :  { %v310_v6 = vpop.f32.mrf.mxu3 }
  0xb0   :  { %323 = vst [vmem:[#allocation2 + $0x18] sm:$0xff] %v310_v6 }
  0xb1   :  { %v274_v8 = vpop.f32.mrf.mxu1  ;;  %v371_v23 = vld [vmem:[#allocation2] sm:$0xf] }
  0xb2   :  { %v291_v7 = vpop.f32.mrf.mxu2  ;;  %325 = vst [vmem:[#allocation2 + $0x68] sm:$0xff] %v274_v8 }
  0xb3   :  { %322 = vst [vmem:[#allocation2 + $0x58] sm:$0xff] %v291_v7  ;;  %v253_v9 = vpop.f32.mrf.mxu0 }
  0xb4   :  { %320 = vst [vmem:[#allocation2 + $0x30] sm:$0xff] %v253_v9 }
  0xb7   :  { %v312_v11 = vpop.f32.mrf.mxu3  ;;  %v373_v55 = vld [vmem:[#allocation2 + $0x18] sm:$0xf] }
  0xb8   :  { %327 = vst [vmem:[#allocation2 + $0x48] sm:$0xff] %v312_v11 }
  0xb9   :  { %v277_v14 = vpop.f32.mrf.mxu1 }
  0xba   :  { %v293_v13 = vpop.f32.mrf.mxu2  ;;  %329 = vst [vmem:[#allocation2 + $0x20] sm:$0xff] %v277_v14  ;;  %v372_v59 = vld [vmem:[#allocation2 + $0x58] sm:$0xf] }
  0xbb   :  { %326 = vst [vmem:[#allocation2 + $0x8] sm:$0xff] %v293_v13  ;;  %v255_v15 = vpop.f32.mrf.mxu0  ;;  %v370_v29 = vld [vmem:[#allocation2 + $0x30] sm:$0xf] }
  0xbc   :  { %324 = vst [vmem:[#allocation2 + $0x50] sm:$0xff] %v255_v15 }
  0xbf   :  { %v315_v17 = vpop.f32.mrf.mxu3 }
  0xc0   :  { %331 = vst [vmem:[#allocation2 + $0x38] sm:$0xff] %v315_v17 }
  0xc1   :  { %v279_v19 = vpop.f32.mrf.mxu1 }
  0xc2   :  { %v296_v18 = vpop.f32.mrf.mxu2  ;;  %333 = vst [vmem:[#allocation2 + $0x70] sm:$0xff] %v279_v19 }
  0xc3   :  { %330 = vst [vmem:[#allocation2 + $0x10] sm:$0xff] %v296_v18 }
  0xc7   :  { %v317_v20 = vpop.f32.mrf.mxu3 }
  0xc8   :  { %335 = vst [vmem:[#allocation2 + $0x28] sm:$0xff] %v317_v20 }
  0xc9   :  { %v520_v24 = vpop.f32.mrf.mxu1 }
  0xca   :  { %v298_v21 = vpop.f32.mrf.mxu2  ;;  %v551_v26 = vadd.f32 %v520_v24, %v371_v23 }
  0xcb   :  { %334 = vst [vmem:[#allocation2 + $0x78] sm:$0xff] %v298_v21 }
  0xcc   :  { %v2250_v28 = vmul.f32 -1.442695, %v551_v26 }
  0xce   :  { %2521 = vpow2.f32 %v2250_v28 }
  0xcf   :  { %v507_v30 = vpop.f32.mrf.mxu3 }
  0xd0   :  { %v550_v33 = vadd.f32 %v507_v30, %v370_v29 }
  0xd1   :  { %v522_v34 = vpop.f32.mrf.mxu1 }
  0xd2   :  { %v533_v31 = vpop.f32.mrf.mxu2  ;;  %v2249_v36 = vmul.f32 -1.442695, %v550_v33 }
  0xd3   :  { %v552_v5 = vadd.f32 %v533_v31, %v372_v59  ;;  %v258_v59 = vpop.f32.mrf.mxu0 }
  0xd4   :  { %v2522_v38 = vpop.eup %2521  ;;  %2523 = vpow2.f32 %v2249_v36  ;;  %328 = vst [vmem:[#allocation2 + $0x40] sm:$0xff] %v258_v59 }
  0xd5   :  { %v576_v39 = vadd.f32 1.0, %v2522_v38 }
  0xd7   :  { %2525 = vrcp.f32 %v576_v39  ;;  %v509_v40 = vpop.f32.mrf.mxu3  ;;  %v588_v13 = vand.u32 2147483648, %v576_v39  ;;  %vm582_vm4 = vweird.f32 %v576_v39  ;;  %v586_v17 = vand.u32 2147483647, %v576_v39 }
  0xd9   :  { %v589_v24 = vor.u32 1.1754944e-38, %v588_v13  ;;  %vm587_vm9 = vcmp.eq.f32.partialorder %v586_v17, 8.507059e+37 }
  0xda   :  { %v535_v41 = vpop.f32.mrf.mxu2  ;;  %v2524_v42 = vpop.eup %2523 }
  0xdb   :  { %v557_v47 = vadd.f32 1.0, %v2524_v42 }
  0xdd   :  { %v2526_v48 = vpop.eup %2525  ;;  %2527 = vrcp.f32 %v557_v47  ;;  %v569_v8 = vand.u32 2147483648, %v557_v47  ;;  %v567_v15 = vand.u32 2147483647, %v557_v47  ;;  %vm563_vm5 = vweird.f32 %v557_v47 }
  0xde   :  { %v578_v52 = vmul.f32 %v2526_v48, %v576_v39  ;;  %vm583_vm2 = vweird.f32 %v2526_v48 }
  0xdf   :  { %v546_v57 = vpop.f32.mrf.mxu3  ;;  %vm584_vm6 = vmor %vm582_vm4, %vm583_vm2  ;;  %v570_v20 = vor.u32 1.1754944e-38, %v569_v8  ;;  %vm568_vm8 = vcmp.eq.f32.partialorder %v567_v15, 8.507059e+37  ;;  %vm2818_vm2 = vmmov 1   ;;  %vm623_vm4 = vcmask 781698  }
  0xe0   :  { %v579_v53 = vsub.f32 1.0, %v578_v52  ;;  %v553_v60 = vadd.f32 %v546_v57, %v373_v55 }
  0xe2   :  { %v2251_v61 = vmul.f32 -1.442695, %v553_v60  ;;  %v580_v2 = vmul.f32 %v2526_v48, %v579_v53  ;;  %v360_v60 = vlaneseq }
  0xe3   :  { %v2528_v1 = vpop.eup %2527 }
  0xe4   :  { %v559_v6 = vmul.f32 %v2528_v1, %v557_v47  ;;  %2529 = vpow2.f32 %v2251_v61  ;;  %v581_v9 = vadd.f32 %v2526_v48, %v580_v2  ;;  %vm564_vm3 = vweird.f32 %v2528_v1  ;;  %v260_v61 = vpop.f32.mrf.mxu0 }
  0xe5   :  { %2531 = vtanh.f32 %v552_v5  ;;  %vm565_vm7 = vmor %vm563_vm5, %vm564_vm3  ;;  %332 = vst [vmem:[#allocation2 + $0x60] sm:$0xff] %v260_v61  ;;  %v3152_v2 = vand.u32 127, %v360_v60  ;;  %vm625_vm5 = vcmask 392192   ;;  %v2819_v5 = vmov 0.0  }
  0xe6   :  { %v560_v7 = vsub.f32 1.0, %v559_v6  ;;  %v585_v21 = vsel %vm584_vm6, %v2526_v48, %v581_v9  ;;  %vm494_vm6 = vcmask 785408  }
  0xe7   :  { %v548_v11 = vpop.f32.mrf.mxu3  ;;  %v590_v30 = vsel %vm587_vm9, %v589_v24, %v585_v21  ;;  %vm365_vm0 = vcmp.lt.s32.totalorder %v3152_v2, 48 }
  0xe8   :  { %v561_v14 = vmul.f32 %v2528_v1, %v560_v7  ;;  %v612_v33 = vmul.f32 0.0, %v590_v30 }
  0xea   :  { %v2530_v18 = vpop.eup %2529  ;;  %v562_v19 = vadd.f32 %v2528_v1, %v561_v14 }
  0xeb   :  { %v596_v23 = vadd.f32 1.0, %v2530_v18  ;;  %v2532_v28 = vpop.eup %2531  ;;  %v628_v18 = vld [vmem:[#allocation2 + $0x30] sm:$0xf0] }
  0xec   :  { %v566_v26 = vsel %vm565_vm7, %v2528_v1, %v562_v19  ;;  %v3150_v1 = vshrl.u32 %v360_v60, 7  ;;  %v629_v19 = vld [vmem:[#allocation2] sm:$0xf0] }
  0xed   :  { %v571_v29 = vsel %vm568_vm8, %v570_v20, %v566_v26  ;;  %2533 = vrcp.f32 %v596_v23  ;;  %v608_v40 = vand.u32 2147483648, %v596_v23  ;;  %v606_v42 = vand.u32 2147483647, %v596_v23 }
  0xee   :  { %v613_v31 = vmul.f32 %v2532_v28, %v571_v29  ;;  %vm602_vm11 = vweird.f32 %v596_v23  ;;  %vm364_vm15 = vcmp.lt.s32.totalorder %v3150_v1, 2 }
  0xef   :  { %v609_v48 = vor.u32 1.1754944e-38, %v608_v40  ;;  %vm607_vm13 = vcmp.eq.f32.partialorder %v606_v42, 8.507059e+37  ;;  %vm366_vm1 = vmxor %vm364_vm15, %vm365_vm0 }
  0xf0   :  { %v3145_v36 = vadd.f32 %v613_v31, %v612_v33  ;;  %vm367_vm3 = vmxor %vm366_vm1, %vm2818_vm2  ;;  %v631_v33 = vld [vmem:[#allocation2 + $0x18] sm:$0xf0] }
  0xf1   :  { %v3156_v6 = vsel %vm367_vm3, 1.0, %v2819_v5 }
  0xf2   :  { %2535 = vtanh.f32 %v3145_v36 }
  0xf3   :  { %v2534_v34 = vpop.eup %2533 }
  0xf4   :  { %v598_v38 = vmul.f32 %v2534_v34, %v596_v23  ;;  %vm603_vm10 = vweird.f32 %v2534_v34 }
  0xf5   :  { %vm604_vm12 = vmor %vm602_vm11, %vm603_vm10 }
  0xf6   :  { %v599_v39 = vsub.f32 1.0, %v598_v38 }
  0xf8   :  { %v600_v41 = vmul.f32 %v2534_v34, %v599_v39  ;;  %v2536_v53 = vpop.eup %2535 }
  0xfa   :  { %v601_v47 = vadd.f32 %v2534_v34, %v600_v41 }
  0xfc   :  { %v605_v52 = vsel %vm604_vm12, %v2534_v34, %v601_v47 }
  0xfd   :  { %v610_v55 = vsel %vm607_vm13, %v609_v48, %v605_v52 }
  0xfe   :  { %v616_v57 = vmul.f32 %v2536_v53, %v610_v55  ;;  %v630_v55 = vld [vmem:[#allocation2 + $0x58] sm:$0xf0] }
 0x100   :  { %620 = vrot.lane.b32.xlu0 %v616_v57, %s2817_s0  ;;  %618 = vst.msk [vmem:[#allocation3] sm:$0x3] %vm617_vm14, %v616_v57 }
 0x172   :  { %v621_v7 = vpop.permute.xlu0 %620 }
 0x173   :  { %624 = vst.msk [vmem:[#allocation3 + $0xc] sm:$0xc] %vm623_vm4, %v621_v7  ;;  %v626_v8 = vsel %vm625_vm5, %v616_v57, %v621_v7 }
 0x174   :  { %v627_v9 = vmul.f32 %v3156_v6, %v626_v8 }
 0x176   :  { %v632_v11 = vpack.c.bf16 %v627_v9, %v627_v9 }
 0x178   :  { %2252 = vmatmul.msk.bf16.vlgmr.msrb.gmra.mxu0 %vm494_vm6, %v632_v11  ;;  %2253 = vmatmul.msk.bf16.vlgmr.msra.gmra.mxu1 %vm494_vm6, %v632_v11 }
 0x179   :  { %2254 = vmatmul.msk.bf16.vlgmr.msra.gmra.mxu2 %vm494_vm6, %v632_v11  ;;  %2255 = vmatmul.msk.bf16.vlgmr.msrb.gmra.mxu3 %vm494_vm6, %v632_v11 }
 0x17a   :  { %931 = vmatpush.bf16.msrb.mxu0 %v2991_v50  ;;  %944 = vmatpush.bf16.msra.mxu1 %v2993_v51 }
 0x17b   :  { %957 = vmatpush.bf16.msra.mxu2 %v3002_v56  ;;  %970 = vmatpush.bf16.msrb.mxu3 %v3071_v45 }
 0x17e   :  { %932 = vmatpush.bf16.msrb.mxu0 %v3005_v62  ;;  %945 = vmatpush.bf16.msra.mxu1 %v3008_v0 }
 0x17f   :  { %958 = vmatpush.bf16.msra.mxu2 %v3019_v4  ;;  %971 = vmatpush.bf16.msrb.mxu3 %v3082_v49 }
 0x182   :  { %933 = vmatpush.bf16.msrb.mxu0 %v3026_v10  ;;  %946 = vmatpush.bf16.msra.mxu1 %v3029_v12 }
 0x183   :  { %959 = vmatpush.bf16.msra.mxu2 %v3038_v16  ;;  %972 = vmatpush.bf16.msrb.mxu3 %v3089_v54 }
 0x186   :  { %934 = vmatpush.bf16.msrb.mxu0 %v3041_v22  ;;  %947 = vmatpush.bf16.msra.mxu1 %v3044_v25 }
 0x187   :  { %960 = vmatpush.bf16.msra.mxu2 %v3047_v27  ;;  %973 = vmatpush.bf16.msrb.mxu3 %v3095_v58 }
 0x18a   :  { %935 = vmatpush.bf16.msrb.mxu0 %v3053_v32  ;;  %948 = vmatpush.bf16.msra.mxu1 %v3056_v35 }
 0x18b   :  { %961 = vmatpush.bf16.msra.mxu2 %v3059_v37  ;;  %974 = vmatpush.bf16.msrb.mxu3 %v3102_v63 }
 0x18e   :  { %936 = vmatpush.bf16.msrb.mxu0 %v3065_v43  ;;  %949 = vmatpush.bf16.msra.mxu1 %v3068_v44 }
 0x18f   :  { %962 = vmatpush.bf16.msra.mxu2 %v3074_v46  ;;  %975 = vmatpush.bf16.msrb.mxu3 %v3108_v3 }
 0x1f5   :  { %v645_v13 = vpop.f32.mrf.mxu0  ;;  %v658_v14 = vpop.f32.mrf.mxu1 }
 0x1f6   :  { %v692_v15 = vrot.slane %v645_v13, 4  ;;  %v693_v17 = vrot.slane %v658_v14, 4 }
 0x1f8   :  { %v700_v20 = vadd.f32 %v692_v15, %v628_v18  ;;  %v701_v21 = vadd.f32 %v693_v17, %v629_v19 }
 0x1fa   :  { %v2256_v23 = vmul.f32 -1.442695, %v700_v20  ;;  %v2257_v24 = vmul.f32 -1.442695, %v701_v21 }
 0x1fc   :  { %2537 = vpow2.f32 %v2256_v23  ;;  %v671_v26 = vpop.f32.mrf.mxu2  ;;  %v684_v28 = vpop.f32.mrf.mxu3 }
 0x1fd   :  { %2539 = vpow2.f32 %v2257_v24  ;;  %v695_v29 = vrot.slane %v684_v28, 4  ;;  %v647_v30 = vpop.f32.mrf.mxu0  ;;  %v660_v31 = vpop.f32.mrf.mxu1  ;;  %v694_v52 = vrot.slane %v671_v26, 4  ;;  %v763_v26 = vrot.slane %v3145_v36, 4 }
 0x1ff   :  { %v703_v34 = vadd.f32 %v695_v29, %v631_v33  ;;  %v702_v60 = vadd.f32 %v694_v52, %v630_v55 }
 0x201   :  { %v2258_v38 = vmul.f32 -1.442695, %v703_v34 }
 0x202   :  { %v2538_v39 = vpop.eup %2537 }
 0x203   :  { %v2540_v40 = vpop.eup %2539  ;;  %v707_v41 = vadd.f32 1.0, %v2538_v39  ;;  %2541 = vpow2.f32 %v2258_v38 }
 0x204   :  { %v726_v42 = vadd.f32 1.0, %v2540_v40  ;;  %v673_v47 = vpop.f32.mrf.mxu2  ;;  %v686_v48 = vpop.f32.mrf.mxu3 }
 0x205   :  { %2543 = vrcp.f32 %v707_v41  ;;  %v719_v11 = vand.u32 2147483648, %v707_v41  ;;  %v717_v15 = vand.u32 2147483647, %v707_v41  ;;  %vm713_vm9 = vweird.f32 %v707_v41 }
 0x206   :  { %2545 = vrcp.f32 %v726_v42  ;;  %v738_v13 = vand.u32 2147483648, %v726_v42  ;;  %v736_v18 = vand.u32 2147483647, %v726_v42  ;;  %vm732_vm10 = vweird.f32 %v726_v42 }
 0x207   :  { %v720_v21 = vor.u32 1.1754944e-38, %v719_v11  ;;  %vm718_vm13 = vcmp.eq.f32.partialorder %v717_v15, 8.507059e+37 }
 0x208   :  { %v739_v28 = vor.u32 1.1754944e-38, %v738_v13  ;;  %vm737_vm15 = vcmp.eq.f32.partialorder %v736_v18, 8.507059e+37  ;;  %v784_v13 = vld [vmem:[#allocation2 + $0x68] sm:$0xf] }
 0x209   :  { %v2542_v53 = vpop.eup %2541 }
 0x20a   :  { %v746_v57 = vadd.f32 1.0, %v2542_v53 }
 0x20b   :  { %v2544_v59 = vpop.eup %2543 }
 0x20c   :  { %v2546_v61 = vpop.eup %2545  ;;  %v709_v5 = vmul.f32 %v2544_v59, %v707_v41  ;;  %2547 = vrcp.f32 %v746_v57  ;;  %vm714_vm7 = vweird.f32 %v2544_v59  ;;  %v758_v48 = vand.u32 2147483648, %v746_v57 }
 0x20d   :  { %v728_v7 = vmul.f32 %v2546_v61, %v726_v42  ;;  %2549 = vtanh.f32 %v702_v60  ;;  %vm733_vm8 = vweird.f32 %v2546_v61  ;;  %vm715_vm11 = vmor %vm713_vm9, %vm714_vm7  ;;  %vm752_vm1 = vweird.f32 %v746_v57 }
 0x20e   :  { %v710_v8 = vsub.f32 1.0, %v709_v5  ;;  %vm734_vm12 = vmor %vm732_vm10, %vm733_vm8  ;;  %v756_v36 = vand.u32 2147483647, %v746_v57  ;;  %v759_v53 = vor.u32 1.1754944e-38, %v758_v48  ;;  %vm770_vm7 = vcmask 390148  }
 0x20f   :  { %v729_v9 = vsub.f32 1.0, %v728_v7  ;;  %vm776_vm8 = vcmask 785798  }
 0x210   :  { %v711_v14 = vmul.f32 %v2544_v59, %v710_v8  ;;  %vm757_vm3 = vcmp.eq.f32.partialorder %v756_v36, 8.507059e+37 }
 0x211   :  { %v730_v17 = vmul.f32 %v2546_v61, %v729_v9  ;;  %v783_v9 = vld [vmem:[#allocation2 + $0x50] sm:$0xf] }
 0x212   :  { %v2548_v19 = vpop.eup %2547  ;;  %v712_v20 = vadd.f32 %v2544_v59, %v711_v14 }
 0x213   :  { %v731_v23 = vadd.f32 %v2546_v61, %v730_v17  ;;  %v748_v24 = vmul.f32 %v2548_v19, %v746_v57  ;;  %v2550_v30 = vpop.eup %2549  ;;  %vm753_vm0 = vweird.f32 %v2548_v19 }
 0x214   :  { %v716_v29 = vsel %vm715_vm11, %v2544_v59, %v712_v20  ;;  %vm754_vm2 = vmor %vm752_vm1, %vm753_vm0 }
 0x215   :  { %v721_v31 = vsel %vm718_vm13, %v720_v21, %v716_v29  ;;  %v735_v33 = vsel %vm734_vm12, %v2546_v61, %v731_v23  ;;  %v749_v34 = vsub.f32 1.0, %v748_v24  ;;  %v786_v21 = vld [vmem:[#allocation2 + $0x48] sm:$0xf] }
 0x216   :  { %v740_v38 = vsel %vm737_vm15, %v739_v28, %v735_v33  ;;  %v766_v39 = vmul.f32 %v2550_v30, %v721_v31 }
 0x217   :  { %v765_v40 = vmul.f32 %v763_v26, %v740_v38  ;;  %v750_v41 = vmul.f32 %v2548_v19, %v749_v34 }
 0x219   :  { %v3190_v42 = vadd.f32 %v766_v39, %v765_v40  ;;  %v751_v47 = vadd.f32 %v2548_v19, %v750_v41  ;;  %v785_v41 = vld [vmem:[#allocation2 + $0x8] sm:$0xf] }
 0x21b   :  { %2551 = vtanh.f32 %v3190_v42  ;;  %v755_v52 = vsel %vm754_vm2, %v2548_v19, %v751_v47 }
 0x21c   :  { %v760_v59 = vsel %vm757_vm3, %v759_v53, %v755_v52 }
 0x221   :  { %v2552_v55 = vpop.eup %2551 }
 0x222   :  { %v769_v60 = vmul.f32 %v2552_v55, %v760_v59 }
 0x224   :  { %773 = vrot.lane.b32.xlu0 %v769_v60, %s2817_s0  ;;  %771 = vst.msk [vmem:[#allocation3 - $0x2] sm:$0x30] %vm770_vm7, %v769_v60 }
 0x296   :  { %v774_v61 = vpop.permute.xlu0 %773 }
 0x297   :  { %777 = vst.msk [vmem:[#allocation3 + $0x6] sm:$0xc0] %vm776_vm8, %v774_v61  ;;  %v778_v5 = vsel %vm625_vm5, %v769_v60, %v774_v61 }
 0x298   :  { %v780_v7 = vrot.slane %v778_v5, 4 }
 0x29a   :  { %v782_v57 = vmul.f32 %v3156_v6, %v780_v7 }
 0x29c   :  { %v787_v8 = vpack.c.bf16 %v782_v57, %v782_v57 }
 0x29e   :  { %2259 = vmatmul.msk.bf16.vlgmr.msra.gmra.mxu0 %vm494_vm6, %v787_v8  ;;  %2260 = vmatmul.msk.bf16.vlgmr.msrb.gmra.mxu1 %vm494_vm6, %v787_v8 }
 0x29f   :  { %2261 = vmatmul.msk.bf16.vlgmr.msrb.gmra.mxu2 %vm494_vm6, %v787_v8  ;;  %2262 = vmatmul.msk.bf16.vlgmr.msra.gmra.mxu3 %vm494_vm6, %v787_v8 }
 0x2a0   :  { %1084 = vmatpush.bf16.msra.mxu0 %v2991_v50  ;;  %1097 = vmatpush.bf16.msrb.mxu1 %v2993_v51 }
 0x2a1   :  { %1110 = vmatpush.bf16.msrb.mxu2 %v3002_v56  ;;  %1123 = vmatpush.bf16.msra.mxu3 %v3071_v45 }
 0x2a4   :  { %1085 = vmatpush.bf16.msra.mxu0 %v3005_v62  ;;  %1098 = vmatpush.bf16.msrb.mxu1 %v3008_v0 }
 0x2a5   :  { %1111 = vmatpush.bf16.msrb.mxu2 %v3019_v4  ;;  %1124 = vmatpush.bf16.msra.mxu3 %v3082_v49 }
 0x2a8   :  { %1086 = vmatpush.bf16.msra.mxu0 %v3026_v10  ;;  %1099 = vmatpush.bf16.msrb.mxu1 %v3029_v12 }
 0x2a9   :  { %1112 = vmatpush.bf16.msrb.mxu2 %v3038_v16  ;;  %1125 = vmatpush.bf16.msra.mxu3 %v3089_v54 }
 0x2ac   :  { %1087 = vmatpush.bf16.msra.mxu0 %v3041_v22  ;;  %1100 = vmatpush.bf16.msrb.mxu1 %v3044_v25 }
 0x2ad   :  { %1113 = vmatpush.bf16.msrb.mxu2 %v3047_v27  ;;  %1126 = vmatpush.bf16.msra.mxu3 %v3095_v58 }
 0x2b0   :  { %1088 = vmatpush.bf16.msra.mxu0 %v3053_v32  ;;  %1101 = vmatpush.bf16.msrb.mxu1 %v3056_v35 }
 0x2b1   :  { %1114 = vmatpush.bf16.msrb.mxu2 %v3059_v37  ;;  %1127 = vmatpush.bf16.msra.mxu3 %v3102_v63 }
 0x2b4   :  { %1089 = vmatpush.bf16.msra.mxu0 %v3065_v43  ;;  %1102 = vmatpush.bf16.msrb.mxu1 %v3068_v44 }
 0x2b5   :  { %1115 = vmatpush.bf16.msrb.mxu2 %v3074_v46  ;;  %1128 = vmatpush.bf16.msra.mxu3 %v3108_v3 }
 0x31b   :  { %v800_v11 = vpop.f32.mrf.mxu0  ;;  %v813_v14 = vpop.f32.mrf.mxu1 }
 0x31c   :  { %v843_v15 = vadd.f32 %v800_v11, %v783_v9  ;;  %v844_v17 = vadd.f32 %v813_v14, %v784_v13 }
 0x31e   :  { %v2263_v18 = vmul.f32 -1.442695, %v843_v15  ;;  %v2264_v19 = vmul.f32 -1.442695, %v844_v17 }
 0x320   :  { %2553 = vpow2.f32 %v2263_v18 }
 0x321   :  { %2555 = vpow2.f32 %v2264_v19 }
 0x322   :  { %v826_v20 = vpop.f32.mrf.mxu2  ;;  %v839_v23 = vpop.f32.mrf.mxu3 }
 0x323   :  { %v846_v24 = vadd.f32 %v839_v23, %v786_v21  ;;  %v802_v26 = vpop.f32.mrf.mxu0  ;;  %v815_v28 = vpop.f32.mrf.mxu1  ;;  %v845_v36 = vadd.f32 %v826_v20, %v785_v41  ;;  %v906_v20 = vrot.slane %v3190_v42, 4 }
 0x325   :  { %v2265_v29 = vmul.f32 -1.442695, %v846_v24 }
 0x326   :  { %v2554_v30 = vpop.eup %2553 }
 0x327   :  { %v2556_v31 = vpop.eup %2555  ;;  %v850_v33 = vadd.f32 1.0, %v2554_v30  ;;  %2557 = vpow2.f32 %v2265_v29 }
 0x328   :  { %v869_v34 = vadd.f32 1.0, %v2556_v31 }
 0x329   :  { %2559 = vrcp.f32 %v850_v33  ;;  %v862_v61 = vand.u32 2147483648, %v850_v33  ;;  %v860_v57 = vand.u32 2147483647, %v850_v33  ;;  %vm856_vm11 = vweird.f32 %v850_v33 }
 0x32a   :  { %2561 = vrcp.f32 %v869_v34  ;;  %v828_v38 = vpop.f32.mrf.mxu2  ;;  %v841_v39 = vpop.f32.mrf.mxu3  ;;  %v881_v5 = vand.u32 2147483648, %v869_v34  ;;  %v879_v9 = vand.u32 2147483647, %v869_v34  ;;  %vm875_vm12 = vweird.f32 %v869_v34 }
 0x32b   :  { %v863_v14 = vor.u32 1.1754944e-38, %v862_v61  ;;  %vm861_vm0 = vcmp.eq.f32.partialorder %v860_v57, 8.507059e+37  ;;  %v922_v57 = vld [vmem:[#allocation2 + $0x68] sm:$0xf0] }
 0x32c   :  { %v882_v18 = vor.u32 1.1754944e-38, %v881_v5  ;;  %vm880_vm1 = vcmp.eq.f32.partialorder %v879_v9, 8.507059e+37 }
 0x32d   :  { %v2558_v40 = vpop.eup %2557 }
 0x32e   :  { %v889_v47 = vadd.f32 1.0, %v2558_v40 }
 0x32f   :  { %v2560_v48 = vpop.eup %2559 }
 0x330   :  { %v2562_v52 = vpop.eup %2561  ;;  %v852_v53 = vmul.f32 %v2560_v48, %v850_v33  ;;  %2563 = vrcp.f32 %v889_v47  ;;  %vm857_vm9 = vweird.f32 %v2560_v48  ;;  %v901_v38 = vand.u32 2147483648, %v889_v47 }
 0x331   :  { %v871_v55 = vmul.f32 %v2562_v52, %v869_v34  ;;  %2565 = vtanh.f32 %v845_v36  ;;  %vm876_vm10 = vweird.f32 %v2562_v52  ;;  %vm858_vm13 = vmor %vm856_vm11, %vm857_vm9  ;;  %vm895_vm3 = vweird.f32 %v889_v47 }
 0x332   :  { %v853_v59 = vsub.f32 1.0, %v852_v53  ;;  %vm877_vm15 = vmor %vm875_vm12, %vm876_vm10  ;;  %v899_v39 = vand.u32 2147483647, %v889_v47  ;;  %v902_v40 = vor.u32 1.1754944e-38, %v901_v38 }
 0x333   :  { %v872_v60 = vsub.f32 1.0, %v871_v55 }
 0x334   :  { %v854_v7 = vmul.f32 %v2560_v48, %v853_v59  ;;  %vm900_vm10 = vcmp.eq.f32.partialorder %v899_v39, 8.507059e+37  ;;  %v923_v39 = vld [vmem:[#allocation2 + $0x8] sm:$0xf0] }
 0x335   :  { %v873_v8 = vmul.f32 %v2562_v52, %v872_v60 }
 0x336   :  { %v2564_v11 = vpop.eup %2563  ;;  %v855_v13 = vadd.f32 %v2560_v48, %v854_v7  ;;  %v921_v7 = vld [vmem:[#allocation2 + $0x50] sm:$0xf0] }
 0x337   :  { %v874_v15 = vadd.f32 %v2562_v52, %v873_v8  ;;  %v891_v17 = vmul.f32 %v2564_v11, %v889_v47  ;;  %v2566_v21 = vpop.eup %2565  ;;  %vm896_vm2 = vweird.f32 %v2564_v11 }
 0x338   :  { %v859_v19 = vsel %vm858_vm13, %v2560_v48, %v855_v13  ;;  %vm897_vm9 = vmor %vm895_vm3, %vm896_vm2 }
 0x339   :  { %v864_v23 = vsel %vm861_vm0, %v863_v14, %v859_v19  ;;  %v878_v24 = vsel %vm877_vm15, %v2562_v52, %v874_v15  ;;  %v892_v26 = vsub.f32 1.0, %v891_v17 }
 0x33a   :  { %v883_v28 = vsel %vm880_vm1, %v882_v18, %v878_v24  ;;  %v909_v29 = vmul.f32 %v2566_v21, %v864_v23 }
 0x33b   :  { %v908_v30 = vmul.f32 %v906_v20, %v883_v28  ;;  %v893_v31 = vmul.f32 %v2564_v11, %v892_v26  ;;  %v924_v20 = vld [vmem:[#allocation2 + $0x48] sm:$0xf0] }
 0x33d   :  { %v3227_v33 = vadd.f32 %v909_v29, %v908_v30  ;;  %v894_v34 = vadd.f32 %v2564_v11, %v893_v31 }
 0x33f   :  { %2567 = vtanh.f32 %v3227_v33  ;;  %v898_v42 = vsel %vm897_vm9, %v2564_v11, %v894_v34 }
 0x340   :  { %v903_v48 = vsel %vm900_vm10, %v902_v40, %v898_v42 }
 0x345   :  { %v2568_v41 = vpop.eup %2567 }
 0x346   :  { %v912_v36 = vmul.f32 %v2568_v41, %v903_v48 }
 0x348   :  { %915 = vrot.lane.b32.xlu1 %v912_v36, %s2817_s0  ;;  %913 = vst.msk [vmem:[#allocation3 + $0x4] sm:$0x3] %vm617_vm14, %v912_v36 }
 0x3ba   :  { %v916_v52 = vpop.permute.xlu1 %915 }
 0x3bb   :  { %918 = vst.msk [vmem:[#allocation3 + $0x8] sm:$0xc] %vm623_vm4, %v916_v52  ;;  %v919_v53 = vsel %vm625_vm5, %v912_v36, %v916_v52 }
 0x3bc   :  { %v920_v55 = vmul.f32 %v3156_v6, %v919_v53 }
 0x3be   :  { %v925_v59 = vpack.c.bf16 %v920_v55, %v920_v55 }
 0x3c0   :  { %2266 = vmatmul.msk.bf16.vlgmr.msrb.gmra.mxu0 %vm494_vm6, %v925_v59  ;;  %2267 = vmatmul.msk.bf16.vlgmr.msra.gmra.mxu1 %vm494_vm6, %v925_v59 }
 0x3c1   :  { %2268 = vmatmul.msk.bf16.vlgmr.msra.gmra.mxu2 %vm494_vm6, %v925_v59  ;;  %2269 = vmatmul.msk.bf16.vlgmr.msrb.gmra.mxu3 %vm494_vm6, %v925_v59 }
 0x3c2   :  { %1222 = vmatpush.bf16.msrb.mxu0 %v2991_v50  ;;  %1235 = vmatpush.bf16.msra.mxu1 %v2993_v51 }
 0x3c3   :  { %1248 = vmatpush.bf16.msra.mxu2 %v3002_v56  ;;  %1261 = vmatpush.bf16.msrb.mxu3 %v3071_v45 }
 0x3c6   :  { %1223 = vmatpush.bf16.msrb.mxu0 %v3005_v62  ;;  %1236 = vmatpush.bf16.msra.mxu1 %v3008_v0 }
 0x3c7   :  { %1249 = vmatpush.bf16.msra.mxu2 %v3019_v4  ;;  %1262 = vmatpush.bf16.msrb.mxu3 %v3082_v49 }
 0x3ca   :  { %1224 = vmatpush.bf16.msrb.mxu0 %v3026_v10  ;;  %1237 = vmatpush.bf16.msra.mxu1 %v3029_v12 }
 0x3cb   :  { %1250 = vmatpush.bf16.msra.mxu2 %v3038_v16  ;;  %1263 = vmatpush.bf16.msrb.mxu3 %v3089_v54 }
 0x3ce   :  { %1225 = vmatpush.bf16.msrb.mxu0 %v3041_v22  ;;  %1238 = vmatpush.bf16.msra.mxu1 %v3044_v25 }
 0x3cf   :  { %1251 = vmatpush.bf16.msra.mxu2 %v3047_v27  ;;  %1264 = vmatpush.bf16.msrb.mxu3 %v3095_v58 }
 0x3d2   :  { %1226 = vmatpush.bf16.msrb.mxu0 %v3053_v32  ;;  %1239 = vmatpush.bf16.msra.mxu1 %v3056_v35 }
 0x3d3   :  { %1252 = vmatpush.bf16.msra.mxu2 %v3059_v37  ;;  %1265 = vmatpush.bf16.msrb.mxu3 %v3102_v63 }
 0x3d6   :  { %1227 = vmatpush.bf16.msrb.mxu0 %v3065_v43  ;;  %1240 = vmatpush.bf16.msra.mxu1 %v3068_v44 }
 0x3d7   :  { %1253 = vmatpush.bf16.msra.mxu2 %v3074_v46  ;;  %1266 = vmatpush.bf16.msrb.mxu3 %v3108_v3 }
 0x43d   :  { %v938_v47 = vpop.f32.mrf.mxu0  ;;  %v951_v60 = vpop.f32.mrf.mxu1 }
 0x43e   :  { %v985_v61 = vrot.slane %v938_v47, 4  ;;  %v986_v5 = vrot.slane %v951_v60, 4 }
 0x440   :  { %v993_v8 = vadd.f32 %v985_v61, %v921_v7  ;;  %v994_v9 = vadd.f32 %v986_v5, %v922_v57 }
 0x442   :  { %v2270_v11 = vmul.f32 -1.442695, %v993_v8  ;;  %v2271_v13 = vmul.f32 -1.442695, %v994_v9 }
 0x444   :  { %2569 = vpow2.f32 %v2270_v11  ;;  %v964_v14 = vpop.f32.mrf.mxu2  ;;  %v977_v15 = vpop.f32.mrf.mxu3 }
 0x445   :  { %2571 = vpow2.f32 %v2271_v13  ;;  %v988_v17 = vrot.slane %v977_v15, 4  ;;  %v940_v18 = vpop.f32.mrf.mxu0  ;;  %v953_v19 = vpop.f32.mrf.mxu1  ;;  %v987_v34 = vrot.slane %v964_v14, 4  ;;  %v1056_v14 = vrot.slane %v3227_v33, 4 }
 0x447   :  { %v996_v21 = vadd.f32 %v988_v17, %v924_v20  ;;  %v995_v41 = vadd.f32 %v987_v34, %v923_v39 }
 0x449   :  { %v2272_v23 = vmul.f32 -1.442695, %v996_v21 }
 0x44a   :  { %v2570_v24 = vpop.eup %2569 }
 0x44b   :  { %v2572_v26 = vpop.eup %2571  ;;  %v1000_v28 = vadd.f32 1.0, %v2570_v24  ;;  %2573 = vpow2.f32 %v2272_v23 }
 0x44c   :  { %v1019_v29 = vadd.f32 1.0, %v2572_v26  ;;  %v966_v30 = vpop.f32.mrf.mxu2  ;;  %v979_v31 = vpop.f32.mrf.mxu3 }
 0x44d   :  { %2575 = vrcp.f32 %v1000_v28  ;;  %v1012_v59 = vand.u32 2147483648, %v1000_v28  ;;  %v1010_v61 = vand.u32 2147483647, %v1000_v28  ;;  %vm1006_vm13 = vweird.f32 %v1000_v28 }
 0x44e   :  { %2577 = vrcp.f32 %v1019_v29  ;;  %v1031_v47 = vand.u32 2147483648, %v1019_v29  ;;  %v1029_v7 = vand.u32 2147483647, %v1019_v29  ;;  %vm1025_vm15 = vweird.f32 %v1019_v29 }
 0x44f   :  { %v1013_v9 = vor.u32 1.1754944e-38, %v1012_v59  ;;  %vm1011_vm2 = vcmp.eq.f32.partialorder %v1010_v61, 8.507059e+37 }
 0x450   :  { %v1032_v15 = vor.u32 1.1754944e-38, %v1031_v47  ;;  %vm1030_vm3 = vcmp.eq.f32.partialorder %v1029_v7, 8.507059e+37  ;;  %v1075_v47 = vld [vmem:[#allocation2 + $0x20] sm:$0xf] }
 0x451   :  { %v2574_v38 = vpop.eup %2573 }
 0x452   :  { %v1039_v42 = vadd.f32 1.0, %v2574_v38 }
 0x453   :  { %v2576_v40 = vpop.eup %2575 }
 0x454   :  { %v2578_v48 = vpop.eup %2577  ;;  %v1002_v36 = vmul.f32 %v2576_v40, %v1000_v28  ;;  %2579 = vrcp.f32 %v1039_v42  ;;  %vm1007_vm11 = vweird.f32 %v2576_v40  ;;  %v1051_v31 = vand.u32 2147483648, %v1039_v42 }
 0x455   :  { %v1021_v52 = vmul.f32 %v2578_v48, %v1019_v29  ;;  %2581 = vtanh.f32 %v995_v41  ;;  %vm1026_vm12 = vweird.f32 %v2578_v48  ;;  %vm1008_vm0 = vmor %vm1006_vm13, %vm1007_vm11  ;;  %vm1045_vm10 = vweird.f32 %v1039_v42 }
 0x456   :  { %v1003_v53 = vsub.f32 1.0, %v1002_v36  ;;  %vm1027_vm1 = vmor %vm1025_vm15, %vm1026_vm12  ;;  %v1049_v33 = vand.u32 2147483647, %v1039_v42  ;;  %v1052_v38 = vor.u32 1.1754944e-38, %v1051_v31 }
 0x457   :  { %v1022_v55 = vsub.f32 1.0, %v1021_v52 }
 0x458   :  { %v1004_v60 = vmul.f32 %v2576_v40, %v1003_v53  ;;  %vm1050_vm12 = vcmp.eq.f32.partialorder %v1049_v33, 8.507059e+37 }
 0x459   :  { %v1023_v5 = vmul.f32 %v2578_v48, %v1022_v55  ;;  %v1074_v55 = vld [vmem:[#allocation2 + $0x40] sm:$0xf] }
 0x45a   :  { %v2580_v57 = vpop.eup %2579  ;;  %v1005_v8 = vadd.f32 %v2576_v40, %v1004_v60 }
 0x45b   :  { %v1024_v11 = vadd.f32 %v2578_v48, %v1023_v5  ;;  %v1041_v13 = vmul.f32 %v2580_v57, %v1039_v42  ;;  %v2582_v18 = vpop.eup %2581  ;;  %vm1046_vm9 = vweird.f32 %v2580_v57 }
 0x45c   :  { %v1009_v17 = vsel %vm1008_vm0, %v2576_v40, %v1005_v8  ;;  %vm1047_vm11 = vmor %vm1045_vm10, %vm1046_vm9 }
 0x45d   :  { %v1014_v19 = vsel %vm1011_vm2, %v1013_v9, %v1009_v17  ;;  %v1028_v20 = vsel %vm1027_vm1, %v2578_v48, %v1024_v11  ;;  %v1042_v21 = vsub.f32 1.0, %v1041_v13  ;;  %v1077_v9 = vld [vmem:[#allocation2 + $0x38] sm:$0xf] }
 0x45e   :  { %v1033_v23 = vsel %vm1030_vm3, %v1032_v15, %v1028_v20  ;;  %v1059_v24 = vmul.f32 %v2582_v18, %v1014_v19 }
 0x45f   :  { %v1058_v26 = vmul.f32 %v1056_v14, %v1033_v23  ;;  %v1043_v28 = vmul.f32 %v2580_v57, %v1042_v21 }
 0x461   :  { %v3264_v29 = vadd.f32 %v1059_v24, %v1058_v26  ;;  %v1044_v30 = vadd.f32 %v2580_v57, %v1043_v28  ;;  %v1076_v28 = vld [vmem:[#allocation2 + $0x10] sm:$0xf] }
 0x463   :  { %2583 = vtanh.f32 %v3264_v29  ;;  %v1048_v34 = vsel %vm1047_vm11, %v2580_v57, %v1044_v30 }
 0x464   :  { %v1053_v40 = vsel %vm1050_vm12, %v1052_v38, %v1048_v34 }
 0x469   :  { %v2584_v39 = vpop.eup %2583 }
 0x46a   :  { %v1062_v41 = vmul.f32 %v2584_v39, %v1053_v40 }
 0x46c   :  { %1065 = vrot.lane.b32.xlu1 %v1062_v41, %s2817_s0  ;;  %1063 = vst.msk [vmem:[#allocation3 + $0x2] sm:$0x30] %vm770_vm7, %v1062_v41 }
 0x4de   :  { %v1066_v48 = vpop.permute.xlu1 %1065 }
 0x4df   :  { %1068 = vst.msk [vmem:[#allocation3 + $0x2] sm:$0xc0] %vm776_vm8, %v1066_v48  ;;  %v1069_v36 = vsel %vm625_vm5, %v1062_v41, %v1066_v48 }
 0x4e0   :  { %v1071_v52 = vrot.slane %v1069_v36, 4 }
 0x4e2   :  { %v1073_v53 = vmul.f32 %v3156_v6, %v1071_v52 }
 0x4e4   :  { %v1078_v42 = vpack.c.bf16 %v1073_v53, %v1073_v53 }
 0x4e6   :  { %2273 = vmatmul.msk.bf16.vlgmr.msra.gmra.mxu0 %vm494_vm6, %v1078_v42  ;;  %2274 = vmatmul.msk.bf16.vlgmr.msrb.gmra.mxu1 %vm494_vm6, %v1078_v42 }
 0x4e7   :  { %2275 = vmatmul.msk.bf16.vlgmr.msrb.gmra.mxu2 %vm494_vm6, %v1078_v42  ;;  %2276 = vmatmul.msk.bf16.vlgmr.msra.gmra.mxu3 %vm494_vm6, %v1078_v42 }
 0x4e8   :  { %1375 = vmatpush.bf16.msra.mxu0 %v2991_v50  ;;  %1388 = vmatpush.bf16.msrb.mxu1 %v2993_v51 }
 0x4e9   :  { %1401 = vmatpush.bf16.msrb.mxu2 %v3002_v56  ;;  %1414 = vmatpush.bf16.msra.mxu3 %v3071_v45 }
 0x4ec   :  { %1376 = vmatpush.bf16.msra.mxu0 %v3005_v62  ;;  %1389 = vmatpush.bf16.msrb.mxu1 %v3008_v0 }
 0x4ed   :  { %1402 = vmatpush.bf16.msrb.mxu2 %v3019_v4  ;;  %1415 = vmatpush.bf16.msra.mxu3 %v3082_v49 }
 0x4f0   :  { %1377 = vmatpush.bf16.msra.mxu0 %v3026_v10  ;;  %1390 = vmatpush.bf16.msrb.mxu1 %v3029_v12 }
 0x4f1   :  { %1403 = vmatpush.bf16.msrb.mxu2 %v3038_v16  ;;  %1416 = vmatpush.bf16.msra.mxu3 %v3089_v54 }
 0x4f4   :  { %1378 = vmatpush.bf16.msra.mxu0 %v3041_v22  ;;  %1391 = vmatpush.bf16.msrb.mxu1 %v3044_v25 }
 0x4f5   :  { %1404 = vmatpush.bf16.msrb.mxu2 %v3047_v27  ;;  %1417 = vmatpush.bf16.msra.mxu3 %v3095_v58 }
 0x4f8   :  { %1379 = vmatpush.bf16.msra.mxu0 %v3053_v32  ;;  %1392 = vmatpush.bf16.msrb.mxu1 %v3056_v35 }
 0x4f9   :  { %1405 = vmatpush.bf16.msrb.mxu2 %v3059_v37  ;;  %1418 = vmatpush.bf16.msra.mxu3 %v3102_v63 }
 0x4fc   :  { %1380 = vmatpush.bf16.msra.mxu0 %v3065_v43  ;;  %1393 = vmatpush.bf16.msrb.mxu1 %v3068_v44 }
 0x4fd   :  { %1406 = vmatpush.bf16.msrb.mxu2 %v3074_v46  ;;  %1419 = vmatpush.bf16.msra.mxu3 %v3108_v3 }
 0x563   :  { %v1091_v59 = vpop.f32.mrf.mxu0  ;;  %v1104_v60 = vpop.f32.mrf.mxu1 }
 0x564   :  { %v1134_v61 = vadd.f32 %v1091_v59, %v1074_v55  ;;  %v1135_v5 = vadd.f32 %v1104_v60, %v1075_v47 }
 0x566   :  { %v2277_v7 = vmul.f32 -1.442695, %v1134_v61  ;;  %v2278_v57 = vmul.f32 -1.442695, %v1135_v5 }
 0x568   :  { %2585 = vpow2.f32 %v2277_v7 }
 0x569   :  { %2587 = vpow2.f32 %v2278_v57 }
 0x56a   :  { %v1117_v8 = vpop.f32.mrf.mxu2  ;;  %v1130_v11 = vpop.f32.mrf.mxu3 }
 0x56b   :  { %v1137_v13 = vadd.f32 %v1130_v11, %v1077_v9  ;;  %v1093_v14 = vpop.f32.mrf.mxu0  ;;  %v1106_v15 = vpop.f32.mrf.mxu1  ;;  %v1136_v33 = vadd.f32 %v1117_v8, %v1076_v28  ;;  %v1197_v8 = vrot.slane %v3264_v29, 4 }
 0x56d   :  { %v2279_v17 = vmul.f32 -1.442695, %v1137_v13 }
 0x56e   :  { %v2586_v18 = vpop.eup %2585 }
 0x56f   :  { %v2588_v19 = vpop.eup %2587  ;;  %v1141_v20 = vadd.f32 1.0, %v2586_v18  ;;  %2589 = vpow2.f32 %v2279_v17 }
 0x570   :  { %v1160_v21 = vadd.f32 1.0, %v2588_v19 }
 0x571   :  { %2591 = vrcp.f32 %v1141_v20  ;;  %v1153_v48 = vand.u32 2147483648, %v1141_v20  ;;  %v1151_v53 = vand.u32 2147483647, %v1141_v20  ;;  %vm1147_vm0 = vweird.f32 %v1141_v20 }
 0x572   :  { %2593 = vrcp.f32 %v1160_v21  ;;  %v1119_v23 = vpop.f32.mrf.mxu2  ;;  %v1132_v24 = vpop.f32.mrf.mxu3  ;;  %v1172_v36 = vand.u32 2147483648, %v1160_v21  ;;  %v1170_v55 = vand.u32 2147483647, %v1160_v21  ;;  %vm1166_vm1 = vweird.f32 %v1160_v21 }
 0x573   :  { %v1154_v60 = vor.u32 1.1754944e-38, %v1153_v48  ;;  %vm1152_vm9 = vcmp.eq.f32.partialorder %v1151_v53, 8.507059e+37  ;;  %v1214_v48 = vld [vmem:[#allocation2 + $0x10] sm:$0xf0] }
 0x574   :  { %v1173_v7 = vor.u32 1.1754944e-38, %v1172_v36  ;;  %vm1171_vm10 = vcmp.eq.f32.partialorder %v1170_v55, 8.507059e+37 }
 0x575   :  { %v2590_v26 = vpop.eup %2589 }
 0x576   :  { %v1180_v30 = vadd.f32 1.0, %v2590_v26 }
 0x577   :  { %v2592_v31 = vpop.eup %2591 }
 0x578   :  { %v2594_v34 = vpop.eup %2593  ;;  %v1143_v38 = vmul.f32 %v2592_v31, %v1141_v20  ;;  %2595 = vrcp.f32 %v1180_v30  ;;  %vm1148_vm13 = vweird.f32 %v2592_v31  ;;  %v1192_v23 = vand.u32 2147483648, %v1180_v30 }
 0x579   :  { %v1162_v39 = vmul.f32 %v2594_v34, %v1160_v21  ;;  %2597 = vtanh.f32 %v1136_v33  ;;  %vm1167_vm15 = vweird.f32 %v2594_v34  ;;  %vm1149_vm2 = vmor %vm1147_vm0, %vm1148_vm13  ;;  %vm1186_vm12 = vweird.f32 %v1180_v30 }
 0x57a   :  { %v1144_v40 = vsub.f32 1.0, %v1143_v38  ;;  %vm1168_vm3 = vmor %vm1166_vm1, %vm1167_vm15  ;;  %v1190_v24 = vand.u32 2147483647, %v1180_v30  ;;  %v1193_v26 = vor.u32 1.1754944e-38, %v1192_v23 }
 0x57b   :  { %v1163_v41 = vsub.f32 1.0, %v1162_v39 }
 0x57c   :  { %v1145_v52 = vmul.f32 %v2592_v31, %v1144_v40  ;;  %vm1191_vm15 = vcmp.eq.f32.partialorder %v1190_v24, 8.507059e+37 }
 0x57d   :  { %v1164_v42 = vmul.f32 %v2594_v34, %v1163_v41 }
 0x57e   :  { %v2596_v59 = vpop.eup %2595  ;;  %v1146_v47 = vadd.f32 %v2592_v31, %v1145_v52 }
 0x57f   :  { %v1165_v61 = vadd.f32 %v2594_v34, %v1164_v42  ;;  %v1182_v5 = vmul.f32 %v2596_v59, %v1180_v30  ;;  %v2598_v9 = vpop.eup %2597  ;;  %vm1187_vm11 = vweird.f32 %v2596_v59 }
 0x580   :  { %v1150_v57 = vsel %vm1149_vm2, %v2592_v31, %v1146_v47  ;;  %vm1188_vm13 = vmor %vm1186_vm12, %vm1187_vm11 }
 0x581   :  { %v1155_v11 = vsel %vm1152_vm9, %v1154_v60, %v1150_v57  ;;  %v1169_v13 = vsel %vm1168_vm3, %v2594_v34, %v1165_v61  ;;  %v1183_v14 = vsub.f32 1.0, %v1182_v5 }
 0x582   :  { %v1174_v15 = vsel %vm1171_vm10, %v1173_v7, %v1169_v13  ;;  %v1200_v17 = vmul.f32 %v2598_v9, %v1155_v11 }
 0x583   :  { %v1199_v18 = vmul.f32 %v1197_v8, %v1174_v15  ;;  %v1184_v19 = vmul.f32 %v2596_v59, %v1183_v14 }
 0x585   :  { %v3301_v20 = vadd.f32 %v1200_v17, %v1199_v18  ;;  %v1185_v21 = vadd.f32 %v2596_v59, %v1184_v19 }
 0x587   :  { %2599 = vtanh.f32 %v3301_v20  ;;  %v1189_v29 = vsel %vm1188_vm13, %v2596_v59, %v1185_v21  ;;  %v1347_v18 = vrot.slane %v3301_v20, 4 }
 0x588   :  { %v1194_v31 = vsel %vm1191_vm15, %v1193_v26, %v1189_v29 }
 0x58d   :  { %v2600_v28 = vpop.eup %2599 }
 0x58e   :  { %v1203_v33 = vmul.f32 %v2600_v28, %v1194_v31 }
 0x590   :  { %1206 = vrot.lane.b32.xlu2 %v1203_v33, %s2817_s0  ;;  %1204 = vst.msk [vmem:[#allocation3 + $0x8] sm:$0x3] %vm617_vm14, %v1203_v33 }
 0x5ea   :  { %v1207_v34 = vpop.permute.xlu2 %1206 }
 0x5eb   :  { %1209 = vst.msk [vmem:[#allocation3 + $0x4] sm:$0xc] %vm623_vm4, %v1207_v34  ;;  %v1210_v38 = vsel %vm625_vm5, %v1203_v33, %v1207_v34 }
 0x5ec   :  { %v1211_v39 = vmul.f32 %v3156_v6, %v1210_v38 }
 0x5ee   :  { %v1216_v40 = vpack.c.bf16 %v1211_v39, %v1211_v39 }
 0x5f0   :  { %2280 = vmatmul.msk.bf16.vlgmr.msrb.gmra.mxu0 %vm494_vm6, %v1216_v40  ;;  %2281 = vmatmul.msk.bf16.vlgmr.msra.gmra.mxu1 %vm494_vm6, %v1216_v40 }
 0x5f1   :  { %2282 = vmatmul.msk.bf16.vlgmr.msra.gmra.mxu2 %vm494_vm6, %v1216_v40  ;;  %2283 = vmatmul.msk.bf16.vlgmr.msrb.gmra.mxu3 %vm494_vm6, %v1216_v40 }
 0x5f2   :  { %1513 = vmatpush.bf16.msrb.mxu0 %v2991_v50  ;;  %1526 = vmatpush.bf16.msra.mxu1 %v2993_v51 }
 0x5f3   :  { %1539 = vmatpush.bf16.msra.mxu2 %v3002_v56  ;;  %1552 = vmatpush.bf16.msrb.mxu3 %v3071_v45 }
 0x5f6   :  { %1514 = vmatpush.bf16.msrb.mxu0 %v3005_v62  ;;  %1527 = vmatpush.bf16.msra.mxu1 %v3008_v0  ;;  %v1212_v0 = vld [vmem:[#allocation2 + $0x40] sm:$0xf0] }
 0x5f7   :  { %1540 = vmatpush.bf16.msra.mxu2 %v3019_v4  ;;  %1553 = vmatpush.bf16.msrb.mxu3 %v3082_v49  ;;  %v1213_v4 = vld [vmem:[#allocation2 + $0x20] sm:$0xf0] }
 0x5fa   :  { %1515 = vmatpush.bf16.msrb.mxu0 %v3026_v10  ;;  %1528 = vmatpush.bf16.msra.mxu1 %v3029_v12 }
 0x5fb   :  { %1541 = vmatpush.bf16.msra.mxu2 %v3038_v16  ;;  %1554 = vmatpush.bf16.msrb.mxu3 %v3089_v54 }
 0x5fe   :  { %1516 = vmatpush.bf16.msrb.mxu0 %v3041_v22  ;;  %1529 = vmatpush.bf16.msra.mxu1 %v3044_v25 }
 0x5ff   :  { %1542 = vmatpush.bf16.msra.mxu2 %v3047_v27  ;;  %1555 = vmatpush.bf16.msrb.mxu3 %v3095_v58 }
 0x602   :  { %1517 = vmatpush.bf16.msrb.mxu0 %v3053_v32  ;;  %1530 = vmatpush.bf16.msra.mxu1 %v3056_v35 }
 0x603   :  { %1543 = vmatpush.bf16.msra.mxu2 %v3059_v37  ;;  %1556 = vmatpush.bf16.msrb.mxu3 %v3102_v63 }
 0x606   :  { %1518 = vmatpush.bf16.msrb.mxu0 %v3065_v43  ;;  %1531 = vmatpush.bf16.msra.mxu1 %v3068_v44  ;;  %v1215_v43 = vld [vmem:[#allocation2 + $0x38] sm:$0xf0] }
 0x607   :  { %1544 = vmatpush.bf16.msra.mxu2 %v3074_v46  ;;  %1557 = vmatpush.bf16.msrb.mxu3 %v3108_v3 }
 0x66d   :  { %v1229_v50 = vpop.f32.mrf.mxu0  ;;  %v1242_v51 = vpop.f32.mrf.mxu1 }
 0x66e   :  { %v1276_v56 = vrot.slane %v1229_v50, 4  ;;  %v1277_v62 = vrot.slane %v1242_v51, 4 }
 0x670   :  { %v1284_v10 = vadd.f32 %v1276_v56, %v1212_v0  ;;  %v1285_v12 = vadd.f32 %v1277_v62, %v1213_v4 }
 0x672   :  { %v2284_v16 = vmul.f32 -1.442695, %v1284_v10  ;;  %v2285_v22 = vmul.f32 -1.442695, %v1285_v12 }
 0x674   :  { %2601 = vpow2.f32 %v2284_v16  ;;  %v1255_v25 = vpop.f32.mrf.mxu2  ;;  %v1268_v27 = vpop.f32.mrf.mxu3 }
 0x675   :  { %2603 = vpow2.f32 %v2285_v22  ;;  %v1279_v32 = vrot.slane %v1268_v27, 4  ;;  %v1231_v35 = vpop.f32.mrf.mxu0  ;;  %v1244_v37 = vpop.f32.mrf.mxu1  ;;  %v1278_v30 = vrot.slane %v1255_v25, 4  ;;  %v1365_v25 = vld [vmem:[#allocation2 + $0x60] sm:$0xf] }
 0x677   :  { %v1287_v44 = vadd.f32 %v1279_v32, %v1215_v43  ;;  %v1286_v53 = vadd.f32 %v1278_v30, %v1214_v48  ;;  %v1366_v32 = vld [vmem:[#allocation2 + $0x70] sm:$0xf] }
 0x679   :  { %v2286_v45 = vmul.f32 -1.442695, %v1287_v44 }
 0x67a   :  { %v2602_v46 = vpop.eup %2601 }
 0x67b   :  { %v2604_v49 = vpop.eup %2603  ;;  %v1291_v54 = vadd.f32 1.0, %v2602_v46  ;;  %2605 = vpow2.f32 %v2286_v45 }
 0x67c   :  { %v1310_v58 = vadd.f32 1.0, %v2604_v49  ;;  %v1257_v63 = vpop.f32.mrf.mxu2  ;;  %v1270_v3 = vpop.f32.mrf.mxu3  ;;  %v1368_v49 = vld [vmem:[#allocation2 + $0x28] sm:$0xf] }
 0x67d   :  { %2607 = vrcp.f32 %v1291_v54  ;;  %v1303_v61 = vand.u32 2147483648, %v1291_v54  ;;  %v1301_v57 = vand.u32 2147483647, %v1291_v54  ;;  %vm1297_vm2 = vweird.f32 %v1291_v54 }
 0x67e   :  { %2609 = vrcp.f32 %v1310_v58  ;;  %v1322_v5 = vand.u32 2147483648, %v1310_v58  ;;  %v1320_v9 = vand.u32 2147483647, %v1310_v58  ;;  %vm1316_vm3 = vweird.f32 %v1310_v58 }
 0x67f   :  { %v1304_v14 = vor.u32 1.1754944e-38, %v1303_v61  ;;  %vm1302_vm11 = vcmp.eq.f32.partialorder %v1301_v57, 8.507059e+37 }
 0x680   :  { %v1323_v19 = vor.u32 1.1754944e-38, %v1322_v5  ;;  %vm1321_vm12 = vcmp.eq.f32.partialorder %v1320_v9, 8.507059e+37 }
 0x681   :  { %v2606_v41 = vpop.eup %2605 }
 0x682   :  { %v1330_v36 = vadd.f32 1.0, %v2606_v41 }
 0x683   :  { %v2608_v52 = vpop.eup %2607 }
 0x684   :  { %v2610_v42 = vpop.eup %2609  ;;  %v1293_v55 = vmul.f32 %v2608_v52, %v1291_v54  ;;  %2611 = vrcp.f32 %v1330_v36  ;;  %vm1298_vm0 = vweird.f32 %v2608_v52  ;;  %v1342_v40 = vand.u32 2147483648, %v1330_v36 }
 0x685   :  { %v1312_v59 = vmul.f32 %v2610_v42, %v1310_v58  ;;  %2613 = vtanh.f32 %v1286_v53  ;;  %vm1317_vm1 = vweird.f32 %v2610_v42  ;;  %vm1299_vm9 = vmor %vm1297_vm2, %vm1298_vm0  ;;  %vm1336_vm15 = vweird.f32 %v1330_v36 }
 0x686   :  { %v1294_v47 = vsub.f32 1.0, %v1293_v55  ;;  %vm1318_vm10 = vmor %vm1316_vm3, %vm1317_vm1  ;;  %v1340_v20 = vand.u32 2147483647, %v1330_v36  ;;  %v1343_v51 = vor.u32 1.1754944e-38, %v1342_v40 }
 0x687   :  { %v1313_v60 = vsub.f32 1.0, %v1312_v59  ;;  %v1367_v59 = vld [vmem:[#allocation2 + $0x78] sm:$0xf] }
 0x688   :  { %v1295_v7 = vmul.f32 %v2608_v52, %v1294_v47  ;;  %vm1341_vm1 = vcmp.eq.f32.partialorder %v1340_v20, 8.507059e+37 }
 0x689   :  { %v1314_v8 = vmul.f32 %v2610_v42, %v1313_v60 }
 0x68a   :  { %v2612_v11 = vpop.eup %2611  ;;  %v1296_v13 = vadd.f32 %v2608_v52, %v1295_v7 }
 0x68b   :  { %v1315_v15 = vadd.f32 %v2610_v42, %v1314_v8  ;;  %v1332_v17 = vmul.f32 %v2612_v11, %v1330_v36  ;;  %v2614_v23 = vpop.eup %2613  ;;  %vm1337_vm13 = vweird.f32 %v2612_v11 }
 0x68c   :  { %v1300_v21 = vsel %vm1299_vm9, %v2608_v52, %v1296_v13  ;;  %vm1338_vm0 = vmor %vm1336_vm15, %vm1337_vm13 }
 0x68d   :  { %v1305_v24 = vsel %vm1302_vm11, %v1304_v14, %v1300_v21  ;;  %v1319_v29 = vsel %vm1318_vm10, %v2610_v42, %v1315_v15  ;;  %v1333_v26 = vsub.f32 1.0, %v1332_v17 }
 0x68e   :  { %v1324_v28 = vsel %vm1321_vm12, %v1323_v19, %v1319_v29  ;;  %v1350_v31 = vmul.f32 %v2614_v23, %v1305_v24 }
 0x68f   :  { %v1349_v33 = vmul.f32 %v1347_v18, %v1324_v28  ;;  %v1334_v34 = vmul.f32 %v2612_v11, %v1333_v26 }
 0x691   :  { %v3338_v38 = vadd.f32 %v1350_v31, %v1349_v33  ;;  %v1335_v39 = vadd.f32 %v2612_v11, %v1334_v34 }
 0x693   :  { %2615 = vtanh.f32 %v3338_v38  ;;  %v1339_v50 = vsel %vm1338_vm0, %v2612_v11, %v1335_v39  ;;  %v1488_v31 = vrot.slane %v3338_v38, 4 }
 0x694   :  { %v1344_v62 = vsel %vm1341_vm1, %v1343_v51, %v1339_v50 }
 0x699   :  { %v2616_v56 = vpop.eup %2615 }
 0x69a   :  { %v1353_v0 = vmul.f32 %v2616_v56, %v1344_v62 }
 0x69c   :  { %1356 = vrot.lane.b32.xlu2 %v1353_v0, %s2817_s0  ;;  %1354 = vst.msk [vmem:[#allocation3 + $0x6] sm:$0x30] %vm770_vm7, %v1353_v0 }
 0x6f6   :  { %v1357_v4 = vpop.permute.xlu2 %1356 }
 0x6f7   :  { %1359 = vst.msk [vmem:[#allocation3 - $0x2] sm:$0xc0] %vm776_vm8, %v1357_v4  ;;  %v1360_v10 = vsel %vm625_vm5, %v1353_v0, %v1357_v4 }
 0x6f8   :  { %v1362_v12 = vrot.slane %v1360_v10, 4 }
 0x6fa   :  { %v1364_v16 = vmul.f32 %v3156_v6, %v1362_v12 }
 0x6fc   :  { %v1369_v22 = vpack.c.bf16 %v1364_v16, %v1364_v16 }
 0x6fe   :  { %2287 = vmatmul.msk.bf16.vlgmr.msra.gmra.mxu0 %vm494_vm6, %v1369_v22  ;;  %2288 = vmatmul.msk.bf16.vlgmr.msrb.gmra.mxu1 %vm494_vm6, %v1369_v22 }
 0x6ff   :  { %2289 = vmatmul.msk.bf16.vlgmr.msrb.gmra.mxu2 %vm494_vm6, %v1369_v22  ;;  %2290 = vmatmul.msk.bf16.vlgmr.msra.gmra.mxu3 %vm494_vm6, %v1369_v22 }
 0x77b   :  { %v1382_v27 = vpop.f32.mrf.mxu0  ;;  %v1395_v35 = vpop.f32.mrf.mxu1 }
 0x77c   :  { %v1425_v37 = vadd.f32 %v1382_v27, %v1365_v25  ;;  %v1426_v43 = vadd.f32 %v1395_v35, %v1366_v32 }
 0x77e   :  { %v2291_v44 = vmul.f32 -1.442695, %v1425_v37  ;;  %v2292_v45 = vmul.f32 -1.442695, %v1426_v43 }
 0x780   :  { %2617 = vpow2.f32 %v2291_v44 }
 0x781   :  { %2619 = vpow2.f32 %v2292_v45  ;;  %v2477_v45 = vld [vmem:[#allocation7 + $0x28] sm:$0xff] }
 0x782   :  { %v1408_v46 = vpop.f32.mrf.mxu2  ;;  %v1421_v54 = vpop.f32.mrf.mxu3  ;;  %1712 = vmatpush.bf16.msra.mxu0 %v2477_v45 }
 0x783   :  { %v1428_v58 = vadd.f32 %v1421_v54, %v1368_v49  ;;  %v1384_v63 = vpop.f32.mrf.mxu0  ;;  %v1397_v3 = vpop.f32.mrf.mxu1  ;;  %v1427_v61 = vadd.f32 %v1408_v46, %v1367_v59  ;;  %v1503_v54 = vld [vmem:[#allocation2 + $0x60] sm:$0xf0]  ;;  %v1506_v59 = vld [vmem:[#allocation2 + $0x28] sm:$0xf0] }
 0x784   :  { %v2476_v63 = vld [vmem:[#allocation7 + $0x20] sm:$0xff] }
 0x785   :  { %v2293_v30 = vmul.f32 -1.442695, %v1428_v58  ;;  %v1504_v58 = vld [vmem:[#allocation2 + $0x70] sm:$0xf0] }
 0x786   :  { %v2618_v41 = vpop.eup %2617  ;;  %1713 = vmatpush.bf16.msra.mxu0 %v2476_v63 }
 0x787   :  { %v2620_v48 = vpop.eup %2619  ;;  %v1432_v36 = vadd.f32 1.0, %v2618_v41  ;;  %2621 = vpow2.f32 %v2293_v30 }
 0x788   :  { %v1451_v52 = vadd.f32 1.0, %v2620_v48  ;;  %v2475_v48 = vld [vmem:[#allocation7 + $0x18] sm:$0xff] }
 0x789   :  { %2623 = vrcp.f32 %v1432_v36  ;;  %v1444_v11 = vand.u32 2147483648, %v1432_v36  ;;  %v1442_v15 = vand.u32 2147483647, %v1432_v36  ;;  %vm1438_vm9 = vweird.f32 %v1432_v36 }
 0x78a   :  { %2625 = vrcp.f32 %v1451_v52  ;;  %v1410_v53 = vpop.f32.mrf.mxu2  ;;  %v1423_v42 = vpop.f32.mrf.mxu3  ;;  %v1463_v13 = vand.u32 2147483648, %v1451_v52  ;;  %v1461_v18 = vand.u32 2147483647, %v1451_v52  ;;  %vm1457_vm10 = vweird.f32 %v1451_v52  ;;  %1714 = vmatpush.bf16.msra.mxu0 %v2475_v48 }
 0x78b   :  { %v1445_v23 = vor.u32 1.1754944e-38, %v1444_v11  ;;  %vm1443_vm13 = vcmp.eq.f32.partialorder %v1442_v15, 8.507059e+37  ;;  %v2472_v15 = vld [vmem:[#allocation7] sm:$0xff] }
 0x78c   :  { %v1464_v26 = vor.u32 1.1754944e-38, %v1463_v13  ;;  %vm1462_vm15 = vcmp.eq.f32.partialorder %v1461_v18, 8.507059e+37  ;;  %v2473_v13 = vld [vmem:[#allocation7 + $0x8] sm:$0xff] }
 0x78d   :  { %v2622_v55 = vpop.eup %2621  ;;  %v1505_v18 = vld [vmem:[#allocation2 + $0x78] sm:$0xf0] }
 0x78e   :  { %v1471_v47 = vadd.f32 1.0, %v2622_v55 }
 0x78f   :  { %v2624_v60 = vpop.eup %2623 }
 0x790   :  { %v2626_v5 = vpop.eup %2625  ;;  %v1434_v7 = vmul.f32 %v2624_v60, %v1432_v36  ;;  %2627 = vrcp.f32 %v1471_v47  ;;  %vm1439_vm2 = vweird.f32 %v2624_v60  ;;  %v1483_v4 = vand.u32 2147483648, %v1471_v47 }
 0x791   :  { %v1453_v57 = vmul.f32 %v2626_v5, %v1451_v52  ;;  %2629 = vtanh.f32 %v1427_v61  ;;  %vm1458_vm3 = vweird.f32 %v2626_v5  ;;  %vm1440_vm11 = vmor %vm1438_vm9, %vm1439_vm2  ;;  %vm1477_vm1 = vweird.f32 %v1471_v47 }
 0x792   :  { %v1435_v8 = vsub.f32 1.0, %v1434_v7  ;;  %vm1459_vm12 = vmor %vm1457_vm10, %vm1458_vm3  ;;  %v1481_v10 = vand.u32 2147483647, %v1471_v47  ;;  %v1484_v12 = vor.u32 1.1754944e-38, %v1483_v4 }
 0x793   :  { %v1454_v9 = vsub.f32 1.0, %v1453_v57 }
 0x794   :  { %v1436_v14 = vmul.f32 %v2624_v60, %v1435_v8  ;;  %vm1482_vm3 = vcmp.eq.f32.partialorder %v1481_v10, 8.507059e+37  ;;  %v2370_v10 = vld [vmem:[#allocation9 + $0x58] sm:$0xf0] }
 0x795   :  { %v1455_v17 = vmul.f32 %v2626_v5, %v1454_v9 }
 0x796   :  { %v2628_v19 = vpop.eup %2627  ;;  %v1437_v21 = vadd.f32 %v2624_v60, %v1436_v14 }
 0x797   :  { %v1456_v24 = vadd.f32 %v2626_v5, %v1455_v17  ;;  %v1473_v29 = vmul.f32 %v2628_v19, %v1471_v47  ;;  %v2630_v33 = vpop.eup %2629  ;;  %vm1478_vm0 = vweird.f32 %v2628_v19 }
 0x798   :  { %v1441_v28 = vsel %vm1440_vm11, %v2624_v60, %v1437_v21  ;;  %vm1479_vm2 = vmor %vm1477_vm1, %vm1478_vm0  ;;  %v2474_v60 = vld [vmem:[#allocation7 + $0x10] sm:$0xff] }
 0x799   :  { %v1446_v34 = vsel %vm1443_vm13, %v1445_v23, %v1441_v28  ;;  %v1460_v39 = vsel %vm1459_vm12, %v2626_v5, %v1456_v24  ;;  %v1474_v40 = vsub.f32 1.0, %v1473_v29  ;;  %1715 = vmatpush.bf16.msra.mxu0 %v2474_v60 }
 0x79a   :  { %v1465_v20 = vsel %vm1462_vm15, %v1464_v26, %v1460_v39  ;;  %v1491_v50 = vmul.f32 %v2630_v33, %v1446_v34  ;;  %v2368_v39 = vld [vmem:[#allocation9 + $0x50] sm:$0xf] }
 0x79b   :  { %v1490_v51 = vmul.f32 %v1488_v31, %v1465_v20  ;;  %v1475_v56 = vmul.f32 %v2628_v19, %v1474_v40  ;;  %v2489_v40 = vld [vmem:[#allocation9 + $0x54] sm:$0xf0] }
 0x79d   :  { %v3351_v62 = vadd.f32 %v1491_v50, %v1490_v51  ;;  %v1476_v0 = vadd.f32 %v2628_v19, %v1475_v56  ;;  %1716 = vmatpush.bf16.msra.mxu0 %v2473_v13  ;;  %v2369_v56 = vor.u32 %v2489_v40, %v2368_v39  ;;  %v2479_v39 = vld [vmem:[#allocation9 + $0x4] sm:$0xf0] }
 0x79f   :  { %2631 = vtanh.f32 %v3351_v62  ;;  %v1480_v38 = vsel %vm1479_vm2, %v2628_v19, %v1476_v0  ;;  %v1638_v26 = vrot.slane %v3351_v62, 4  ;;  %v2488_v0 = vld [vmem:[#allocation9 + $0x54] sm:$0xf]  ;;  %1807 = vmatpush.bf16.msrb.mxu1 %v2369_v56 }
 0x7a0   :  { %v1485_v22 = vsel %vm1482_vm3, %v1484_v12, %v1480_v38  ;;  %v2360_v38 = vld [vmem:[#allocation9 + $0x40] sm:$0xf]  ;;  %v2487_v12 = vld [vmem:[#allocation9 + $0x44] sm:$0xf0]  ;;  %v2373_v62 = vor.u32 %v2488_v0, %v2370_v10  ;;  %vm1889_vm3 = vcmask 130048  }
 0x7a1   :  { %1717 = vmatpush.bf16.msra.mxu0 %v2472_v15 }
 0x7a2   :  { %1821 = vmatpush.bf16.msrb.mxu2 %v2373_v62 }
 0x7a5   :  { %v2632_v16 = vpop.eup %2631 }
 0x7a6   :  { %v1494_v25 = vmul.f32 %v2632_v16, %v1485_v22  ;;  %v2361_v22 = vor.u32 %v2487_v12, %v2360_v38 }
 0x7a8   :  { %1497 = vrot.lane.b32.xlu0 %v1494_v25, %s2817_s0  ;;  %1495 = vst.msk [vmem:[#allocation3 + $0xc] sm:$0x3] %vm617_vm14, %v1494_v25  ;;  %1808 = vmatpush.bf16.msrb.mxu1 %v2361_v22  ;;  %v1736_v22 = vld [vmem:[%s3413_s6] sm:$0x3] }
 0x81a   :  { %v1498_v27 = vpop.permute.xlu0 %1497 }
 0x81b   :  { %1500 = vst.msk [vmem:[#allocation3] sm:$0xc] %vm623_vm4, %v1498_v27  ;;  %v1501_v32 = vsel %vm625_vm5, %v1494_v25, %v1498_v27  ;;  %v2486_v25 = vld [vmem:[#allocation9 + $0x44] sm:$0xf]  ;;  %v2362_v27 = vld [vmem:[#allocation9 + $0x48] sm:$0xf0] }
 0x81c   :  { %v1502_v35 = vmul.f32 %v3156_v6, %v1501_v32 }
 0x81e   :  { %v1507_v37 = vpack.c.bf16 %v1502_v35, %v1502_v35 }
 0x820   :  { %2294 = vmatmul.msk.bf16.vlgmr.msrb.gmra.mxu0 %vm494_vm6, %v1507_v37  ;;  %2295 = vmatmul.msk.bf16.vlgmr.msra.gmra.mxu1 %vm494_vm6, %v1507_v37 }
 0x821   :  { %2296 = vmatmul.msk.bf16.vlgmr.msra.gmra.mxu2 %vm494_vm6, %v1507_v37  ;;  %2297 = vmatmul.msk.bf16.vlgmr.msrb.gmra.mxu3 %vm494_vm6, %v1507_v37  ;;  %v2518_v37 = vld [vmem:[%s3411_s4] ss:$0 sm:$0xff] }
 0x89d   :  { %v1520_v43 = vpop.f32.mrf.mxu0  ;;  %v1533_v44 = vpop.f32.mrf.mxu1 }
 0x89e   :  { %v1567_v46 = vrot.slane %v1520_v43, 4  ;;  %v1568_v49 = vrot.slane %v1533_v44, 4  ;;  %v2352_v43 = vld [vmem:[#allocation9 + $0x30] sm:$0xf]  ;;  %v2485_v44 = vld [vmem:[#allocation9 + $0x34] sm:$0xf0] }
 0x8a0   :  { %v1575_v3 = vadd.f32 %v1567_v46, %v1503_v54  ;;  %v1576_v6 = vadd.f32 %v1568_v49, %v1504_v58  ;;  %v2365_v54 = vor.u32 %v2486_v25, %v2362_v27  ;;  %v1738_v27 = vperm.slane %v1736_v22, 0 }
 0x8a2   :  { %v2298_v30 = vmul.f32 -1.442695, %v1575_v3  ;;  %v2299_v41 = vmul.f32 -1.442695, %v1576_v6  ;;  %v2484_v6 = vld [vmem:[#allocation9 + $0x34] sm:$0xf]  ;;  %1822 = vmatpush.bf16.msrb.mxu2 %v2365_v54 }
 0x8a4   :  { %2633 = vpow2.f32 %v2298_v30  ;;  %v1546_v36 = vpop.f32.mrf.mxu2  ;;  %v1559_v52 = vpop.f32.mrf.mxu3  ;;  %v2354_v30 = vld [vmem:[#allocation9 + $0x38] sm:$0xf0] }
 0x8a5   :  { %2635 = vpow2.f32 %v2299_v41  ;;  %v1570_v53 = vrot.slane %v1559_v52, 4  ;;  %v1522_v42 = vpop.f32.mrf.mxu0  ;;  %v1535_v55 = vpop.f32.mrf.mxu1  ;;  %v1569_v14 = vrot.slane %v1546_v36, 4  ;;  %v2353_v52 = vor.u32 %v2485_v44, %v2352_v43 }
 0x8a6   :  { %v2344_v55 = vld [vmem:[#allocation9 + $0x20] sm:$0xf]  ;;  %v1739_v44 = vperm.slane %v1736_v22, 1 }
 0x8a7   :  { %v1578_v47 = vadd.f32 %v1570_v53, %v1506_v59  ;;  %v1577_v19 = vadd.f32 %v1569_v14, %v1505_v18  ;;  %v2483_v59 = vld [vmem:[#allocation9 + $0x24] sm:$0xf0]  ;;  %1809 = vmatpush.bf16.msrb.mxu1 %v2353_v52 }
 0x8a9   :  { %v2300_v61 = vmul.f32 -1.442695, %v1578_v47 }
 0x8aa   :  { %v2634_v5 = vpop.eup %2633 }
 0x8ab   :  { %v2636_v7 = vpop.eup %2635  ;;  %v1582_v57 = vadd.f32 1.0, %v2634_v5  ;;  %2637 = vpow2.f32 %v2300_v61  ;;  %v2357_v61 = vor.u32 %v2484_v6, %v2354_v30  ;;  %v2482_v5 = vld [vmem:[#allocation9 + $0x24] sm:$0xf] }
 0x8ac   :  { %v1601_v8 = vadd.f32 1.0, %v2636_v7  ;;  %v1548_v9 = vpop.f32.mrf.mxu2  ;;  %v1561_v11 = vpop.f32.mrf.mxu3  ;;  %v2346_v7 = vld [vmem:[#allocation9 + $0x28] sm:$0xf0] }
 0x8ad   :  { %2639 = vrcp.f32 %v1582_v57  ;;  %v1592_v31 = vand.u32 2147483647, %v1582_v57  ;;  %v1594_v34 = vand.u32 2147483648, %v1582_v57  ;;  %vm1588_vm9 = vweird.f32 %v1582_v57  ;;  %1823 = vmatpush.bf16.msrb.mxu2 %v2357_v61 }
 0x8ae   :  { %2641 = vrcp.f32 %v1601_v8  ;;  %v1613_v50 = vand.u32 2147483648, %v1601_v8  ;;  %v1611_v51 = vand.u32 2147483647, %v1601_v8  ;;  %vm1607_vm5 = vweird.f32 %v1601_v8 }
 0x8af   :  { %vm3367_vm10 = vcmp.eq.f32.partialorder %v1592_v31, 8.507059e+37  ;;  %v1595_v45 = vor.u32 1.1754944e-38, %v1594_v34  ;;  %v2349_v13 = vor.u32 %v2482_v5, %v2346_v7  ;;  %v2328_v34 = vld [vmem:[#allocation9] sm:$0xf]  ;;  %v2501_v7 = vld [vmem:[#allocation12 + $0x28] sm:$0xff] }
 0x8b0   :  { %v1614_v63 = vor.u32 1.1754944e-38, %v1613_v50  ;;  %vm1612_vm13 = vcmp.eq.f32.partialorder %v1611_v51, 8.507059e+37  ;;  %v2330_v50 = vld [vmem:[#allocation9 + $0x8] sm:$0xf0]  ;;  %v2329_v51 = vor.u32 %v2479_v39, %v2328_v34  ;;  %v2490_v5 = vld [vmem:[#allocation10] sm:$0xff] }
 0x8b1   :  { %v2638_v17 = vpop.eup %2637  ;;  %1824 = vmatpush.bf16.msrb.mxu2 %v2349_v13 }
 0x8b2   :  { %v3363_v21 = vadd.f32 1.0, %v2638_v17 }
 0x8b3   :  { %v2640_v23 = vpop.eup %2639 }
 0x8b4   :  { %v2642_v24 = vpop.eup %2641  ;;  %v1584_v29 = vmul.f32 %v2640_v23, %v1582_v57  ;;  %2643 = vrcp.f32 %v3363_v21  ;;  %vm1589_vm14 = vweird.f32 %v2640_v23  ;;  %v1633_v11 = vand.u32 2147483648, %v3363_v21 }
 0x8b5   :  { %v1603_v28 = vmul.f32 %v2642_v24, %v1601_v8  ;;  %2645 = vtanh.f32 %v1577_v19  ;;  %vm1608_vm4 = vweird.f32 %v2642_v24  ;;  %vm1590_vm11 = vmor %vm1588_vm9, %vm1589_vm14  ;;  %v2345_v8 = vor.u32 %v2483_v59, %v2344_v55  ;;  %v2494_v55 = vld [vmem:[#allocation10 + $0x20] sm:$0xff]  ;;  %v2492_v59 = vld [vmem:[#allocation10 + $0x10] sm:$0xff] }
 0x8b6   :  { %v1585_v33 = vsub.f32 1.0, %v1584_v29  ;;  %vm1609_vm12 = vmor %vm1607_vm5, %vm1608_vm4  ;;  %vm1627_vm0 = vweird.f32 %v3363_v21  ;;  %v1631_v14 = vand.u32 2147483647, %v3363_v21  ;;  %v1634_v17 = vor.u32 1.1754944e-38, %v1633_v11 }
 0x8b7   :  { %v1604_v20 = vsub.f32 1.0, %v1603_v28  ;;  %1810 = vmatpush.bf16.msrb.mxu1 %v2345_v8  ;;  %v2481_v28 = vld [vmem:[#allocation9 + $0x14] sm:$0xf0]  ;;  %v2499_v8 = vld [vmem:[#allocation12 + $0x18] sm:$0xff] }
 0x8b8   :  { %v1586_v4 = vmul.f32 %v2640_v23, %v1585_v33  ;;  %vm1632_vm2 = vcmp.eq.f32.partialorder %v1631_v14, 8.507059e+37  ;;  %v2338_v33 = vld [vmem:[#allocation9 + $0x18] sm:$0xf0] }
 0x8b9   :  { %v1605_v16 = vmul.f32 %v2642_v24, %v1604_v20  ;;  %v2478_v20 = vld [vmem:[#allocation9 + $0x4] sm:$0xf]  ;;  %v2497_v14 = vld [vmem:[#allocation12 + $0x8] sm:$0xff] }
 0x8ba   :  { %v2644_v32 = vpop.eup %2643  ;;  %v1587_v35 = vadd.f32 %v2640_v23, %v1586_v4  ;;  %v2333_v56 = vor.u32 %v2478_v20, %v2330_v50 }
 0x8bb   :  { %v1606_v46 = vadd.f32 %v2642_v24, %v1605_v16  ;;  %v1623_v49 = vmul.f32 %v2644_v32, %v3363_v21  ;;  %v2646_v58 = vpop.eup %2645  ;;  %vm1628_vm15 = vweird.f32 %v2644_v32  ;;  %v2480_v21 = vld [vmem:[#allocation9 + $0x14] sm:$0xf] }
 0x8bc   :  { %v1591_v3 = vsel %vm1590_vm11, %v2640_v23, %v1587_v35  ;;  %vm1629_vm1 = vmor %vm1627_vm0, %vm1628_vm15  ;;  %v2341_v40 = vor.u32 %v2480_v21, %v2338_v33 }
 0x8bd   :  { %v1596_v41 = vsel %vm3367_vm10, %v1595_v45, %v1591_v3  ;;  %v1610_v48 = vsel %vm1609_vm12, %v2642_v24, %v1606_v46  ;;  %v1624_v36 = vsub.f32 1.0, %v1623_v49 }
 0x8be   :  { %v1641_v53 = vmul.f32 %v2646_v58, %v1596_v41  ;;  %v1615_v42 = vsel %vm1612_vm13, %v1614_v63, %v1610_v48  ;;  %1825 = vmatpush.bf16.msrb.mxu2 %v2341_v40  ;;  %v1867_v58 = vand.u32 1, %v3152_v2  ;;  %v2493_v2 = vld [vmem:[#allocation10 + $0x18] sm:$0xff] }
 0x8bf   :  { %v1625_v47 = vmul.f32 %v2644_v32, %v1624_v36  ;;  %v1640_v60 = vmul.f32 %v1638_v26, %v1615_v42  ;;  %v2336_v26 = vld [vmem:[#allocation9 + $0x10] sm:$0xf]  ;;  %v2495_v42 = vld [vmem:[#allocation10 + $0x28] sm:$0xff] }
 0x8c0   :  { %v2337_v31 = vor.u32 %v2481_v28, %v2336_v26  ;;  %1971 = vmatpush.bf16.msrb.mxu0 %v2495_v42  ;;  %v2520_v26 = vld [vmem:[%s3417_s10] ss:$0 sm:$0xff] }
 0x8c1   :  { %v1642_v57 = vadd.f32 %v1641_v53, %v1640_v60  ;;  %v1626_v9 = vadd.f32 %v2644_v32, %v1625_v47 }
 0x8c2   :  { %1811 = vmatpush.bf16.msrb.mxu1 %v2337_v31  ;;  %1826 = vmatpush.bf16.msrb.mxu2 %v2333_v56 }
 0x8c3   :  { %2647 = vtanh.f32 %v1642_v57  ;;  %v1630_v15 = vsel %vm1629_vm1, %v2644_v32, %v1626_v9  ;;  %v2500_v57 = vld [vmem:[#allocation12 + $0x20] sm:$0xff]  ;;  %v2498_v9 = vld [vmem:[#allocation12 + $0x10] sm:$0xff] }
 0x8c4   :  { %v1635_v19 = vsel %vm1632_vm2, %v1634_v17, %v1630_v15  ;;  %1972 = vmatpush.bf16.msrb.mxu0 %v2494_v55  ;;  %v2496_v15 = vld [vmem:[#allocation12] sm:$0xff]  ;;  %v2519_v17 = vld [vmem:[%s3415_s8] ss:$0 sm:$0xff] }
 0x8c6   :  { %1812 = vmatpush.bf16.msrb.mxu1 %v2329_v51 }
 0x8c8   :  { %1973 = vmatpush.bf16.msrb.mxu0 %v2493_v2 }
 0x8c9   :  { %v2648_v18 = vpop.eup %2647 }
 0x8ca   :  { %v1644_v23 = vmul.f32 %v2648_v18, %v1635_v19  ;;  %2041 = vmatpush.bf16.msra.mxu1 %v2501_v7 }
 0x8cc   :  { %1647 = vrot.lane.b32.xlu1 %v1644_v23, %s2817_s0  ;;  %1645 = vst.msk [vmem:[#allocation3 + $0xa] sm:$0x30] %vm770_vm7, %v1644_v23  ;;  %vm1875_vm7 = vcmp.eq.s32.totalorder %v1867_v58, %v3150_v1  ;;  %1974 = vmatpush.bf16.msrb.mxu0 %v2492_v59  ;;  %v2491_v1 = vld [vmem:[#allocation10 + $0x8] sm:$0xff] }
 0x8ce   :  { %2042 = vmatpush.bf16.msra.mxu1 %v2500_v57 }
 0x8d0   :  { %1975 = vmatpush.bf16.msrb.mxu0 %v2491_v1 }
 0x8d2   :  { %2043 = vmatpush.bf16.msra.mxu1 %v2499_v8 }
 0x8d3   :  { %v1653_v24 = vld [vmem:[#allocation3 + $0xe] sm:$0x3] }
 0x8d4   :  { %v1654_v29 = vpack.c.bf16 %v1653_v24, %v1653_v24  ;;  %v1652_v10 = vld [vmem:[#allocation3 + $0x8] sm:$0xff]  ;;  %1976 = vmatpush.bf16.msrb.mxu0 %v2490_v5 }
 0x8d6   :  { %2325 = vmatmul.msk.bf16.vlgmr.msra.gmra.mxu0 %vm494_vm6, %v1654_v29  ;;  %2044 = vmatpush.bf16.msra.mxu1 %v2498_v9 }
 0x8da   :  { %2045 = vmatpush.bf16.msra.mxu1 %v2497_v14 }
 0x8de   :  { %2046 = vmatpush.bf16.msra.mxu1 %v2496_v15 }
 0x93e   :  { %v1648_v0 = vpop.permute.xlu1 %1647 }
 0x93f   :  { %1650 = vst.msk [vmem:[#allocation3 - $0x6] sm:$0xc0] %vm776_vm8, %v1648_v0  ;;  %vm1877_vm8 = vcmask 123904  }
 0x946   :  { %v1651_v4 = vld [vmem:[#allocation3] sm:$0xff] }
 0x947   :  { %v1723_v38 = vpack.c.bf16 %v1652_v10, %v1651_v4 }
 0x949   :  { %2374 = vmatmul.msk.bf16.vlgmr.msrb.gmra.mxu1 %vm494_vm6, %v1723_v38  ;;  %2375 = vmatmul.msk.bf16.vlgmr.msrb.gmra.mxu2 %vm494_vm6, %v1723_v38 }
 0x953   :  { %v1719_v12 = vpop.f32.mrf.mxu0 }
 0x954   :  { %v1720_v49 = vadd.f32 %v2518_v37, %v1719_v12 }
 0x95b   :  { %v1721_v16 = vpop.f32.mrf.mxu0 }
 0x9c6   :  { %v1814_v62 = vpop.f32.mrf.mxu1 }
 0x9c7   :  { %v1815_v43 = vadd.f32 %v1814_v62, %v1738_v27 }
 0x9cc   :  { %v1828_v25 = vpop.f32.mrf.mxu2 }
 0x9cd   :  { %v1829_v54 = vadd.f32 %v1828_v25, %v1739_v44 }
 0x9ce   :  { %v1816_v32 = vpop.f32.mrf.mxu1 }
 0x9cf   :  { %v1817_v35 = vadd.f32 %v1816_v32, %v1738_v27 }
 0x9d1   :  { %2376 = vmatpush.xpose.msk.msra.mxu3 %vm494_vm6, %v1817_v35 }
 0x9d4   :  { %v1830_v45 = vpop.f32.mrf.mxu2 }
 0x9d5   :  { %v1831_v46 = vadd.f32 %v1830_v45, %v1739_v44  ;;  %2377 = vmatpush.xpose.msk.msra.mxu3 %vm494_vm6, %v1815_v43 }
 0x9d8   :  { %2378 = vmatmul.msk.f32.vlgmr.msra.gmra.mxu3 %vm494_vm6, %v1720_v49 }
 0x9d9   :  { %1907 = vmatpush.msrb.mxu3 %v1831_v46 }
 0x9db   :  { %1908 = vmatpush.msrb.mxu3 %v1829_v54 }
 0xa5b   :  { %v1859_v63 = vpop.f32.mrf.mxu3 }
 0xa5c   :  { %v1862_v3 = vmul.f32 0.10206207, %v1859_v63 }
 0xa5e   :  { %v1876_v6 = vsel %vm1875_vm7, %v1862_v3, -1e+30 }
 0xa5f   :  { %v1878_v30 = vsel %vm1877_vm8, %v1876_v6, -inf }
 0xa60   :  { %1879 = vmax.xlane.f32.xlu2 %v1878_v30 }
 0xad3   :  { %v1880_v41 = vpop.xlane.xlu2 %1879 }
 0xad4   :  { %v1881_v48 = vsub.f32 %v1876_v6, %v1880_v41 }
 0xad6   :  { %v1882_v36 = vmul.f32 1.442695, %v1881_v48 }
 0xad8   :  { %2649 = vpow2.f32 %v1882_v36 }
 0xade   :  { %v2650_v52 = vpop.eup %2649 }
 0xadf   :  { %v1884_v53 = vsel %vm1877_vm8, %v2650_v52, 0.0 }
 0xae0   :  { %1885 = vadd.xlane.f32.xlu0 %v1884_v53 }
 0xb53   :  { %v1886_v47 = vpop.xlane.xlu0 %1885 }
 0xb54   :  { %2651 = vrcp.f32 %v1886_v47 }
 0xb5a   :  { %v2652_v60 = vpop.eup %2651 }
 0xb5b   :  { %v1888_v61 = vmul.f32 %v2652_v60, %v2650_v52 }
 0xb5d   :  { %2379 = vmatmul.msk.f32.vlgmr.msrb.gmra.mxu3 %vm1889_vm3, %v1888_v61 }
 0xbe0   :  { %v1910_v11 = vpop.f32.mrf.mxu3 }
 0xbe1   :  { %v1913_v13 = vpack.c.bf16 %v1910_v11, %v1910_v11 }
 0xbe3   :  { %2404 = vmatmul.msk.bf16.vlgmr.msrb.gmra.mxu0 %vm494_vm6, %v1913_v13 }
 0xc60   :  { %v1978_v18 = vpop.f32.mrf.mxu0 }
 0xc61   :  { %v1979_v19 = vadd.f32 %v2519_v17, %v1978_v18 }
 0xc63   :  { %v1982_v23 = vmax.f32 %v1979_v19, 0.0 }
 0xc65   :  { %v1983_v24 = vpack.c.bf16 %v1982_v23, %v1982_v23 }
 0xc67   :  { %2429 = vmatmul.msk.bf16.vlgmr.msra.gmra.mxu1 %vm494_vm6, %v1983_v24 }
 0xc68   :  { %v1980_v29 = vpop.f32.mrf.mxu0 }
 0xce4   :  { %v2048_v28 = vpop.f32.mrf.mxu1 }
 0xce5   :  { %v2049_v21 = vadd.f32 %v2520_v26, %v2048_v28 }
 0xce7   :  { %2052 = vst [vmem:[#allocation13] sm:$0x3] %v2049_v21 }
 0xce8   :  { %2063 = dma.vmem_to_hbm [thread:$0]  %s2059_s9, 32, %s2061_s30, [#allocation6]  }
 0xcec   :  { %v2050_v31 = vpop.f32.mrf.mxu1 }
 0xced   :  { %2803 = dma.done.wait [#allocation6], 32  }
 0xcee   :  { %2804 = vsyncadd [#allocation6], 4294967264 }
 0xcef   :  { %2068 = vsyncpa [#allocation5], 1 }
 0xcf0   :  { %2069 = vsyncpa [#allocation8], 1 }
 0xcf1   :  { %2070 = vsyncpa [#allocation11], 1 }
 0xcf2   :  { %2071 = vsyncpa [#allocation6], 1 }

</bundles_post_ra>
